<compile_context>
chip_gen: v6e
topology: v6e:2x2x1
jax: 0.10.0
libtpu: 0.0.40
codegen_flags: <defaults>
</compile_context>

<pallas_src>
import functools

import jax
import jax.numpy as jnp
from jax.experimental import pallas as pl
from jax.experimental.pallas import tpu as pltpu

EPS = 1e-5


def _round_up(x, m):
    return ((x + m - 1) // m) * m


def _default_epilogue_dtype():
    """bf16 elementwise epilogue on v6e/v7x (native bf16 VPU); f32 elsewhere (v5e)."""
    try:
        kind = jax.devices()[0].device_kind.lower()
    except Exception:
        return jnp.float32
    if "v6" in kind or "v7" in kind:
        return jnp.bfloat16
    return jnp.float32


# ----------------------------------------------------------------------------
# Kernel
# ----------------------------------------------------------------------------
def looking_kernel(
    x_ref,                      # (TB, D_in_pad)        bf16  (lane-dense)
    w1_ref, b1_ref,             # (D_in_pad, H) bf16, (1, H) ep -- BN1 folded in
    sA_w_ref, sA_b_ref,         # (S, H, H) bf16, (S, 1, H) ep  -- stage l1/bn1 folded
    sB_w_ref, sB_b_ref,         # (S, H, H) bf16, (S, 1, H) ep  -- stage l2/bn2 folded
    w2_ref, b2_ref,             # (H, Dp) bf16, (1, Dp) f32     -- lane-padded head
    out_ref,                    # (TB, Dp)              bf16
    *,
    num_stage,
    epilogue_dtype,
):
    ep = epilogue_dtype

    # w1 (+ folded bn1) -> relu -> (dropout = identity)
    y = jnp.dot(x_ref[...], w1_ref[...],
                preferred_element_type=jnp.float32).astype(ep) + b1_ref[...]
    y = jax.nn.relu(y)

    # residual Linear stages (fully unrolled, static indices)
    for i in range(num_stage):
        r = jnp.dot(y.astype(jnp.bfloat16), sA_w_ref[i],
                    preferred_element_type=jnp.float32).astype(ep) + sA_b_ref[i]
        r = jax.nn.relu(r)
        r = jnp.dot(r.astype(jnp.bfloat16), sB_w_ref[i],
                    preferred_element_type=jnp.float32).astype(ep) + sB_b_ref[i]
        r = jax.nn.relu(r)
        y = y + r

    # w2 -> (dropout = identity) -> sigmoid (bce == False); head math in f32
    z = jnp.dot(y.astype(jnp.bfloat16), w2_ref[...],
                preferred_element_type=jnp.float32) + b2_ref[...]
    out_ref[...] = jax.nn.sigmoid(z).astype(out_ref.dtype)


# ----------------------------------------------------------------------------
# One-time host-side parameter preparation (per checkpoint, NOT per forward)
# ----------------------------------------------------------------------------
def _fold_bn(w, b, gamma, beta, mean, var, eps=EPS):
    """Fold an inference-mode BatchNorm into the preceding Linear (f32)."""
    scale = gamma * jax.lax.rsqrt(var + eps)          # broadcasts over output cols
    return w * scale, (b - mean) * scale + beta


def prepare_looking_params(params, num_stage, *, epilogue_dtype=None):
    """Fold BNs, lane-pad, and cast weights once. Returns (weights, meta)."""
    if epilogue_dtype is None:
        epilogue_dtype = _default_epilogue_dtype()

    D_in, H = params["w1"].shape
    D_out = params["w2"].shape[1]
    S = num_stage

    # Fold BatchNorms into the preceding linears (in f32 for accuracy).
    w1f, b1f = _fold_bn(params["w1"], params["b1"],
                        params["bn1_g"], params["bn1_b"],
                        params["bn1_m"], params["bn1_v"])
    sAwf, sAbf = _fold_bn(params["sA_w"], params["sA_b"],
                          params["sA_g"], params["sA_be"],
                          params["sA_m"], params["sA_v"])
    sBwf, sBbf = _fold_bn(params["sB_w"], params["sB_b"],
                          params["sB_g"], params["sB_be"],
                          params["sB_m"], params["sB_v"])

    # Lane-dense input/output: pad D_in and D_out up to multiples of 128.
    D_in_p = _round_up(D_in, 128)
    D_out_p = _round_up(D_out, 128)
    w1p = jnp.zeros((D_in_p, H), jnp.float32).at[:D_in].set(w1f)
    w2p = jnp.zeros((H, D_out_p), jnp.float32).at[:, :D_out].set(params["w2"])
    b2p = jnp.zeros((1, D_out_p), jnp.float32).at[:, :D_out].set(params["b2"])

    weights = {
        "w1": w1p.astype(jnp.bfloat16),
        "b1": b1f.astype(epilogue_dtype),
        "sA_w": sAwf.astype(jnp.bfloat16),
        "sA_b": sAbf.astype(epilogue_dtype),
        "sB_w": sBwf.astype(jnp.bfloat16),
        "sB_b": sBbf.astype(epilogue_dtype),
        "w2": w2p.astype(jnp.bfloat16),
        "b2": b2p.astype(jnp.float32),      # head bias stays f32 (added pre-sigmoid)
    }
    meta = dict(D_in=D_in, D_in_pad=D_in_p, D_out=D_out, D_out_pad=D_out_p,
                H=H, S=S, epilogue_dtype=epilogue_dtype)
    return weights, meta


# ----------------------------------------------------------------------------
# Forward pass
# ----------------------------------------------------------------------------
def looking_model_pallas(x, weights, meta, *, batch_tile=128):
    B = x.shape[0]
    D_in, D_in_p = meta["D_in"], meta["D_in_pad"]
    D_out, D_out_p = meta["D_out"], meta["D_out_pad"]
    H, S = meta["H"], meta["S"]

    # Adaptive batch tile: 16-row granularity (bf16 sublane packing), capped at
    # batch_tile. Large batches get a multi-step "parallel" grid (megacore).
    TB = min(batch_tile, _round_up(max(B, 1), 16))
    B_pad = _round_up(B, TB)

    # Only per-call activation work: cast to bf16 + zero-pad to (B_pad, D_in_pad).
    x_p = jnp.pad(x.astype(jnp.bfloat16), ((0, B_pad - B), (0, D_in_p - D_in)))

    grid = (B_pad // TB,)
    const2 = lambda i: (0, 0)       # weights/biases stay resident in VMEM
    const3 = lambda i: (0, 0, 0)

    flops = 2 * B_pad * (D_in_p * H + S * 2 * H * H + H * D_out_p)
    bytes_accessed = (
        int(x_p.size) * 2
        + sum(int(a.size * a.dtype.itemsize) for a in weights.values())
        + B_pad * D_out_p * 2
    )

    out = pl.pallas_call(
        functools.partial(looking_kernel, num_stage=S,
                          epilogue_dtype=meta["epilogue_dtype"]),
        out_shape=jax.ShapeDtypeStruct((B_pad, D_out_p), jnp.bfloat16),
        grid=grid,
        in_specs=[
            pl.BlockSpec((TB, D_in_p), lambda i: (i, 0)),   # x: tiled over batch
            pl.BlockSpec((D_in_p, H), const2),              # w1 (BN folded, row-padded)
            pl.BlockSpec((1, H), const2),                   # b1
            pl.BlockSpec((S, H, H), const3),                # stage l1 weights
            pl.BlockSpec((S, 1, H), const3),                # stage l1 biases
            pl.BlockSpec((S, H, H), const3),                # stage l2 weights
            pl.BlockSpec((S, 1, H), const3),                # stage l2 biases
            pl.BlockSpec((H, D_out_p), const2),             # w2 (lane-padded)
            pl.BlockSpec((1, D_out_p), const2),             # b2
        ],
        out_specs=pl.BlockSpec((TB, D_out_p), lambda i: (i, 0)),
        compiler_params=pltpu.CompilerParams(
            dimension_semantics=("parallel",)),
        cost_estimate=pl.CostEstimate(
            flops=flops,
            transcendentals=B_pad * D_out_p,
            bytes_accessed=bytes_accessed),
    )(x_p, weights["w1"], weights["b1"], weights["sA_w"], weights["sA_b"],
      weights["sB_w"], weights["sB_b"], weights["w2"], weights["b2"])

    return out[:B, :D_out]


# ----------------------------------------------------------------------------
# Pure-JAX reference (unfused, f32) -- mirrors the PyTorch module in eval mode
# ----------------------------------------------------------------------------
def _bn(y, gamma, beta, mean, var):
    return (y - mean) * jax.lax.rsqrt(var + EPS) * gamma + beta


def looking_model_ref(x, p, num_stage):
    y = x @ p["w1"] + p["b1"]
    y = _bn(y, p["bn1_g"], p["bn1_b"], p["bn1_m"], p["bn1_v"])
    y = jnp.maximum(y, 0.0)
    for i in range(num_stage):
        r = y @ p["sA_w"][i] + p["sA_b"][i]
        r = _bn(r, p["sA_g"][i], p["sA_be"][i], p["sA_m"][i], p["sA_v"][i])
        r = jnp.maximum(r, 0.0)
        r = r @ p["sB_w"][i] + p["sB_b"][i]
        r = _bn(r, p["sB_g"][i], p["sB_be"][i], p["sB_m"][i], p["sB_v"][i])
        r = jnp.maximum(r, 0.0)
        y = y + r
    z = y @ p["w2"] + p["b2"]
    return jax.nn.sigmoid(z)


def init_params(key, input_size, linear_size, output_size, num_stage):
    ks = jax.random.split(key, 32)
    k = iter(ks)
    n = lambda shape, scale=0.05: (scale * jax.random.normal(next(k), shape)).astype(jnp.float32)
    pos = lambda shape: (0.5 + jnp.abs(jax.random.normal(next(k), shape))).astype(jnp.float32)

    H, S = linear_size, num_stage
    return {
        "w1": n((input_size, H)), "b1": n((1, H)),
        "bn1_g": 1.0 + n((1, H)), "bn1_b": n((1, H)),
        "bn1_m": n((1, H)), "bn1_v": pos((1, H)),
        "sA_w": n((S, H, H)), "sA_b": n((S, 1, H)),
        "sA_g": 1.0 + n((S, 1, H)), "sA_be": n((S, 1, H)),
        "sA_m": n((S, 1, H)), "sA_v": pos((S, 1, H)),
        "sB_w": n((S, H, H)), "sB_b": n((S, 1, H)),
        "sB_g": 1.0 + n((S, 1, H)), "sB_be": n((S, 1, H)),
        "sB_m": n((S, 1, H)), "sB_v": pos((S, 1, H)),
        "w2": n((H, output_size)), "b2": n((1, output_size)),
    }


if __name__ == "__main__":
    # LookingModel(input_size=32, linear_size=256, output_size=1, num_stage=3)
    B, D_IN, H, D_OUT, NUM_STAGE = 8, 32, 256, 1, 3

    key = jax.random.PRNGKey(0)
    k_x, k_p = jax.random.split(key)
    x = jax.random.normal(k_x, (B, D_IN), dtype=jnp.float32)
    params = init_params(k_p, D_IN, H, D_OUT, NUM_STAGE)

    # One-time weight prep (fold BN, pad, cast); cached across forward calls.
    weights, meta = prepare_looking_params(params, NUM_STAGE)
    weights = jax.block_until_ready(weights)

    out = looking_model_pallas(x, weights, meta)
    out = jax.block_until_ready(out)

    ref = looking_model_ref(x, params, NUM_STAGE)
    assert out.shape == (B, D_OUT)
    # bf16 matmul operands / epilogue / output -> loosen tolerance vs f32 reference.
    assert jnp.allclose(out.astype(jnp.float32), ref, atol=2e-2, rtol=2e-2), \
        "mismatch vs JAX reference"

    print("KERNEL_OK")
</pallas_src>

<mosaic_0001>
module attributes {stable_mosaic.version = 11 : i64} {
  func.func @looking_kernel(%arg0: i32, %arg1: memref<16x128xbf16, #tpu.memory_space<vmem>>, %arg2: memref<128x256xbf16, #tpu.memory_space<vmem>>, %arg3: memref<1x256xf32, #tpu.memory_space<vmem>>, %arg4: memref<3x256x256xbf16, #tpu.memory_space<vmem>>, %arg5: memref<3x1x256xf32, #tpu.memory_space<vmem>>, %arg6: memref<3x256x256xbf16, #tpu.memory_space<vmem>>, %arg7: memref<3x1x256xf32, #tpu.memory_space<vmem>>, %arg8: memref<256x128xbf16, #tpu.memory_space<vmem>>, %arg9: memref<1x128xf32, #tpu.memory_space<vmem>>, %arg10: memref<16x128xbf16, #tpu.memory_space<vmem>>) attributes {dimension_semantics = [#tpu.dimension_semantics<parallel>], iteration_bounds = array<i64: 1>, scalar_prefetch = 0 : i64, scratch_operands = 0 : i64, tpu.core_type = #tpu.core_type<tc>, window_params = [{transform_indices = @transform_0, window_bounds = array<i64: 16, 128>}, {pipeline_mode = #tpu.pipeline_mode<synchronous>, transform_indices = @transform_1, window_bounds = array<i64: 128, 256>}, {pipeline_mode = #tpu.pipeline_mode<synchronous>, transform_indices = @transform_2, window_bounds = array<i64: 1, 256>}, {pipeline_mode = #tpu.pipeline_mode<synchronous>, transform_indices = @transform_3, window_bounds = array<i64: 3, 256, 256>}, {pipeline_mode = #tpu.pipeline_mode<synchronous>, transform_indices = @transform_4, window_bounds = array<i64: 3, 1, 256>}, {pipeline_mode = #tpu.pipeline_mode<synchronous>, transform_indices = @transform_5, window_bounds = array<i64: 3, 256, 256>}, {pipeline_mode = #tpu.pipeline_mode<synchronous>, transform_indices = @transform_6, window_bounds = array<i64: 3, 1, 256>}, {pipeline_mode = #tpu.pipeline_mode<synchronous>, transform_indices = @transform_7, window_bounds = array<i64: 256, 128>}, {pipeline_mode = #tpu.pipeline_mode<synchronous>, transform_indices = @transform_8, window_bounds = array<i64: 1, 128>}, {transform_indices = @transform_9, window_bounds = array<i64: 16, 128>}]} {
    %c0 = arith.constant 0 : index
    %c0_0 = arith.constant 0 : index
    %0 = vector.load %arg1[%c0, %c0_0] : memref<16x128xbf16, #tpu.memory_space<vmem>>, vector<16x128xbf16>
    %c0_1 = arith.constant 0 : index
    %c0_2 = arith.constant 0 : index
    %1 = vector.load %arg2[%c0_1, %c0_2] : memref<128x256xbf16, #tpu.memory_space<vmem>>, vector<128x256xbf16>
    %cst = arith.constant dense<0.000000e+00> : vector<16x256xf32>
    %2 = tpu.matmul %0, %1, %cst {dimension_numbers = #tpu.dot_dimension_numbers<[1], [0], [0], [1], [0, 0, 1, 1], [], []>} : vector<16x128xbf16>, vector<128x256xbf16>, vector<16x256xf32> -> vector<16x256xf32>
    %c0_3 = arith.constant 0 : index
    %c0_4 = arith.constant 0 : index
    %3 = vector.load %arg3[%c0_3, %c0_4] : memref<1x256xf32, #tpu.memory_space<vmem>>, vector<1x256xf32>
    %4 = vector.broadcast %3 : vector<1x256xf32> to vector<16x256xf32>
    %5 = arith.addf %2, %4 : vector<16x256xf32>
    %cst_5 = arith.constant 0.000000e+00 : f32
    %6 = vector.broadcast %cst_5 : f32 to vector<16x256xf32>
    %7 = arith.maximumf %5, %6 : vector<16x256xf32>
    %8 = arith.truncf %7 : vector<16x256xf32> to vector<16x256xbf16>
    %c0_6 = arith.constant 0 : index
    %c0_7 = arith.constant 0 : index
    %c0_8 = arith.constant 0 : index
    %9 = vector.load %arg4[%c0_6, %c0_7, %c0_8] : memref<3x256x256xbf16, #tpu.memory_space<vmem>>, vector<1x256x256xbf16>
    %10 = vector.shape_cast %9 : vector<1x256x256xbf16> to vector<256x256xbf16>
    %cst_9 = arith.constant dense<0.000000e+00> : vector<16x256xf32>
    %11 = tpu.matmul %8, %10, %cst_9 {dimension_numbers = #tpu.dot_dimension_numbers<[1], [0], [0], [1], [0, 0, 1, 1], [], []>} : vector<16x256xbf16>, vector<256x256xbf16>, vector<16x256xf32> -> vector<16x256xf32>
    %c0_10 = arith.constant 0 : index
    %c0_11 = arith.constant 0 : index
    %c0_12 = arith.constant 0 : index
    %12 = vector.load %arg5[%c0_10, %c0_11, %c0_12] : memref<3x1x256xf32, #tpu.memory_space<vmem>>, vector<1x1x256xf32>
    %13 = vector.shape_cast %12 : vector<1x1x256xf32> to vector<1x256xf32>
    %14 = vector.broadcast %13 : vector<1x256xf32> to vector<16x256xf32>
    %15 = arith.addf %11, %14 : vector<16x256xf32>
    %cst_13 = arith.constant 0.000000e+00 : f32
    %16 = vector.broadcast %cst_13 : f32 to vector<16x256xf32>
    %17 = arith.maximumf %15, %16 : vector<16x256xf32>
    %18 = arith.truncf %17 : vector<16x256xf32> to vector<16x256xbf16>
    %c0_14 = arith.constant 0 : index
    %c0_15 = arith.constant 0 : index
    %c0_16 = arith.constant 0 : index
    %19 = vector.load %arg6[%c0_14, %c0_15, %c0_16] : memref<3x256x256xbf16, #tpu.memory_space<vmem>>, vector<1x256x256xbf16>
    %20 = vector.shape_cast %19 : vector<1x256x256xbf16> to vector<256x256xbf16>
    %cst_17 = arith.constant dense<0.000000e+00> : vector<16x256xf32>
    %21 = tpu.matmul %18, %20, %cst_17 {dimension_numbers = #tpu.dot_dimension_numbers<[1], [0], [0], [1], [0, 0, 1, 1], [], []>} : vector<16x256xbf16>, vector<256x256xbf16>, vector<16x256xf32> -> vector<16x256xf32>
    %c0_18 = arith.constant 0 : index
    %c0_19 = arith.constant 0 : index
    %c0_20 = arith.constant 0 : index
    %22 = vector.load %arg7[%c0_18, %c0_19, %c0_20] : memref<3x1x256xf32, #tpu.memory_space<vmem>>, vector<1x1x256xf32>
    %23 = vector.shape_cast %22 : vector<1x1x256xf32> to vector<1x256xf32>
    %24 = vector.broadcast %23 : vector<1x256xf32> to vector<16x256xf32>
    %25 = arith.addf %21, %24 : vector<16x256xf32>
    %cst_21 = arith.constant 0.000000e+00 : f32
    %26 = vector.broadcast %cst_21 : f32 to vector<16x256xf32>
    %27 = arith.maximumf %25, %26 : vector<16x256xf32>
    %28 = arith.addf %7, %27 : vector<16x256xf32>
    %29 = arith.truncf %28 : vector<16x256xf32> to vector<16x256xbf16>
    %c1 = arith.constant 1 : index
    %c0_22 = arith.constant 0 : index
    %c0_23 = arith.constant 0 : index
    %30 = vector.load %arg4[%c1, %c0_22, %c0_23] : memref<3x256x256xbf16, #tpu.memory_space<vmem>>, vector<1x256x256xbf16>
    %31 = vector.shape_cast %30 : vector<1x256x256xbf16> to vector<256x256xbf16>
    %cst_24 = arith.constant dense<0.000000e+00> : vector<16x256xf32>
    %32 = tpu.matmul %29, %31, %cst_24 {dimension_numbers = #tpu.dot_dimension_numbers<[1], [0], [0], [1], [0, 0, 1, 1], [], []>} : vector<16x256xbf16>, vector<256x256xbf16>, vector<16x256xf32> -> vector<16x256xf32>
    %c1_25 = arith.constant 1 : index
    %c0_26 = arith.constant 0 : index
    %c0_27 = arith.constant 0 : index
    %33 = vector.load %arg5[%c1_25, %c0_26, %c0_27] : memref<3x1x256xf32, #tpu.memory_space<vmem>>, vector<1x1x256xf32>
    %34 = vector.shape_cast %33 : vector<1x1x256xf32> to vector<1x256xf32>
    %35 = vector.broadcast %34 : vector<1x256xf32> to vector<16x256xf32>
    %36 = arith.addf %32, %35 : vector<16x256xf32>
    %cst_28 = arith.constant 0.000000e+00 : f32
    %37 = vector.broadcast %cst_28 : f32 to vector<16x256xf32>
    %38 = arith.maximumf %36, %37 : vector<16x256xf32>
    %39 = arith.truncf %38 : vector<16x256xf32> to vector<16x256xbf16>
    %c1_29 = arith.constant 1 : index
    %c0_30 = arith.constant 0 : index
    %c0_31 = arith.constant 0 : index
    %40 = vector.load %arg6[%c1_29, %c0_30, %c0_31] : memref<3x256x256xbf16, #tpu.memory_space<vmem>>, vector<1x256x256xbf16>
    %41 = vector.shape_cast %40 : vector<1x256x256xbf16> to vector<256x256xbf16>
    %cst_32 = arith.constant dense<0.000000e+00> : vector<16x256xf32>
    %42 = tpu.matmul %39, %41, %cst_32 {dimension_numbers = #tpu.dot_dimension_numbers<[1], [0], [0], [1], [0, 0, 1, 1], [], []>} : vector<16x256xbf16>, vector<256x256xbf16>, vector<16x256xf32> -> vector<16x256xf32>
    %c1_33 = arith.constant 1 : index
    %c0_34 = arith.constant 0 : index
    %c0_35 = arith.constant 0 : index
    %43 = vector.load %arg7[%c1_33, %c0_34, %c0_35] : memref<3x1x256xf32, #tpu.memory_space<vmem>>, vector<1x1x256xf32>
    %44 = vector.shape_cast %43 : vector<1x1x256xf32> to vector<1x256xf32>
    %45 = vector.broadcast %44 : vector<1x256xf32> to vector<16x256xf32>
    %46 = arith.addf %42, %45 : vector<16x256xf32>
    %cst_36 = arith.constant 0.000000e+00 : f32
    %47 = vector.broadcast %cst_36 : f32 to vector<16x256xf32>
    %48 = arith.maximumf %46, %47 : vector<16x256xf32>
    %49 = arith.addf %28, %48 : vector<16x256xf32>
    %50 = arith.truncf %49 : vector<16x256xf32> to vector<16x256xbf16>
    %c2 = arith.constant 2 : index
    %c0_37 = arith.constant 0 : index
    %c0_38 = arith.constant 0 : index
    %51 = vector.load %arg4[%c2, %c0_37, %c0_38] : memref<3x256x256xbf16, #tpu.memory_space<vmem>>, vector<1x256x256xbf16>
    %52 = vector.shape_cast %51 : vector<1x256x256xbf16> to vector<256x256xbf16>
    %cst_39 = arith.constant dense<0.000000e+00> : vector<16x256xf32>
    %53 = tpu.matmul %50, %52, %cst_39 {dimension_numbers = #tpu.dot_dimension_numbers<[1], [0], [0], [1], [0, 0, 1, 1], [], []>} : vector<16x256xbf16>, vector<256x256xbf16>, vector<16x256xf32> -> vector<16x256xf32>
    %c2_40 = arith.constant 2 : index
    %c0_41 = arith.constant 0 : index
    %c0_42 = arith.constant 0 : index
    %54 = vector.load %arg5[%c2_40, %c0_41, %c0_42] : memref<3x1x256xf32, #tpu.memory_space<vmem>>, vector<1x1x256xf32>
    %55 = vector.shape_cast %54 : vector<1x1x256xf32> to vector<1x256xf32>
    %56 = vector.broadcast %55 : vector<1x256xf32> to vector<16x256xf32>
    %57 = arith.addf %53, %56 : vector<16x256xf32>
    %cst_43 = arith.constant 0.000000e+00 : f32
    %58 = vector.broadcast %cst_43 : f32 to vector<16x256xf32>
    %59 = arith.maximumf %57, %58 : vector<16x256xf32>
    %60 = arith.truncf %59 : vector<16x256xf32> to vector<16x256xbf16>
    %c2_44 = arith.constant 2 : index
    %c0_45 = arith.constant 0 : index
    %c0_46 = arith.constant 0 : index
    %61 = vector.load %arg6[%c2_44, %c0_45, %c0_46] : memref<3x256x256xbf16, #tpu.memory_space<vmem>>, vector<1x256x256xbf16>
    %62 = vector.shape_cast %61 : vector<1x256x256xbf16> to vector<256x256xbf16>
    %cst_47 = arith.constant dense<0.000000e+00> : vector<16x256xf32>
    %63 = tpu.matmul %60, %62, %cst_47 {dimension_numbers = #tpu.dot_dimension_numbers<[1], [0], [0], [1], [0, 0, 1, 1], [], []>} : vector<16x256xbf16>, vector<256x256xbf16>, vector<16x256xf32> -> vector<16x256xf32>
    %c2_48 = arith.constant 2 : index
    %c0_49 = arith.constant 0 : index
    %c0_50 = arith.constant 0 : index
    %64 = vector.load %arg7[%c2_48, %c0_49, %c0_50] : memref<3x1x256xf32, #tpu.memory_space<vmem>>, vector<1x1x256xf32>
    %65 = vector.shape_cast %64 : vector<1x1x256xf32> to vector<1x256xf32>
    %66 = vector.broadcast %65 : vector<1x256xf32> to vector<16x256xf32>
    %67 = arith.addf %63, %66 : vector<16x256xf32>
    %cst_51 = arith.constant 0.000000e+00 : f32
    %68 = vector.broadcast %cst_51 : f32 to vector<16x256xf32>
    %69 = arith.maximumf %67, %68 : vector<16x256xf32>
    %70 = arith.addf %49, %69 : vector<16x256xf32>
    %71 = arith.truncf %70 : vector<16x256xf32> to vector<16x256xbf16>
    %c0_52 = arith.constant 0 : index
    %c0_53 = arith.constant 0 : index
    %72 = vector.load %arg8[%c0_52, %c0_53] : memref<256x128xbf16, #tpu.memory_space<vmem>>, vector<256x128xbf16>
    %cst_54 = arith.constant dense<0.000000e+00> : vector<16x128xf32>
    %73 = tpu.matmul %71, %72, %cst_54 {dimension_numbers = #tpu.dot_dimension_numbers<[1], [0], [0], [1], [0, 0, 1, 1], [], []>} : vector<16x256xbf16>, vector<256x128xbf16>, vector<16x128xf32> -> vector<16x128xf32>
    %c0_55 = arith.constant 0 : index
    %c0_56 = arith.constant 0 : index
    %74 = vector.load %arg9[%c0_55, %c0_56] : memref<1x128xf32, #tpu.memory_space<vmem>>, vector<1x128xf32>
    %75 = vector.broadcast %74 : vector<1x128xf32> to vector<16x128xf32>
    %76 = arith.addf %73, %75 : vector<16x128xf32>
    %77 = arith.negf %76 : vector<16x128xf32>
    %78 = math.exp %77 : vector<16x128xf32>
    %cst_57 = arith.constant 1.000000e+00 : f32
    %79 = vector.broadcast %cst_57 : f32 to vector<16x128xf32>
    %80 = arith.addf %79, %78 : vector<16x128xf32>
    %81 = arith.divf %79, %80 : vector<16x128xf32>
    %82 = arith.truncf %81 : vector<16x128xf32> to vector<16x128xbf16>
    %c0_58 = arith.constant 0 : index
    %c0_59 = arith.constant 0 : index
    %83 = vector.load %arg10[%c0_58, %c0_59] : memref<16x128xbf16, #tpu.memory_space<vmem>>, vector<16x128xbf16>
    tpu.vector_store %arg10[%c0_58, %c0_59], %82 {strides = array<i32>} : memref<16x128xbf16, #tpu.memory_space<vmem>>, vector<16x128xbf16>,
    return
  }
  func.func @transform_0(%arg0: i32) -> (i32, i32) {
    %c0_i32 = arith.constant 0 : i32
    %c0_i32_0 = arith.constant 0 : i32
    return %arg0, %c0_i32 : i32, i32
  }
  func.func @transform_1(%arg0: i32) -> (i32, i32) {
    %c0_i32 = arith.constant 0 : i32
    %c0_i32_0 = arith.constant 0 : i32
    %c0_i32_1 = arith.constant 0 : i32
    return %c0_i32, %c0_i32_0 : i32, i32
  }
  func.func @transform_2(%arg0: i32) -> (i32, i32) {
    %c0_i32 = arith.constant 0 : i32
    %c0_i32_0 = arith.constant 0 : i32
    %c0_i32_1 = arith.constant 0 : i32
    return %c0_i32, %c0_i32_0 : i32, i32
  }
  func.func @transform_3(%arg0: i32) -> (i32, i32, i32) {
    %c0_i32 = arith.constant 0 : i32
    %c0_i32_0 = arith.constant 0 : i32
    %c0_i32_1 = arith.constant 0 : i32
    %c0_i32_2 = arith.constant 0 : i32
    return %c0_i32, %c0_i32_0, %c0_i32_1 : i32, i32, i32
  }
  func.func @transform_4(%arg0: i32) -> (i32, i32, i32) {
    %c0_i32 = arith.constant 0 : i32
    %c0_i32_0 = arith.constant 0 : i32
    %c0_i32_1 = arith.constant 0 : i32
    %c0_i32_2 = arith.constant 0 : i32
    return %c0_i32, %c0_i32_0, %c0_i32_1 : i32, i32, i32
  }
  func.func @transform_5(%arg0: i32) -> (i32, i32, i32) {
    %c0_i32 = arith.constant 0 : i32
    %c0_i32_0 = arith.constant 0 : i32
    %c0_i32_1 = arith.constant 0 : i32
    %c0_i32_2 = arith.constant 0 : i32
    return %c0_i32, %c0_i32_0, %c0_i32_1 : i32, i32, i32
  }
  func.func @transform_6(%arg0: i32) -> (i32, i32, i32) {
    %c0_i32 = arith.constant 0 : i32
    %c0_i32_0 = arith.constant 0 : i32
    %c0_i32_1 = arith.constant 0 : i32
    %c0_i32_2 = arith.constant 0 : i32
    return %c0_i32, %c0_i32_0, %c0_i32_1 : i32, i32, i32
  }
  func.func @transform_7(%arg0: i32) -> (i32, i32) {
    %c0_i32 = arith.constant 0 : i32
    %c0_i32_0 = arith.constant 0 : i32
    %c0_i32_1 = arith.constant 0 : i32
    return %c0_i32, %c0_i32_0 : i32, i32
  }
  func.func @transform_8(%arg0: i32) -> (i32, i32) {
    %c0_i32 = arith.constant 0 : i32
    %c0_i32_0 = arith.constant 0 : i32
    %c0_i32_1 = arith.constant 0 : i32
    return %c0_i32, %c0_i32_0 : i32, i32
  }
  func.func @transform_9(%arg0: i32) -> (i32, i32) {
    %c0_i32 = arith.constant 0 : i32
    %c0_i32_0 = arith.constant 0 : i32
    return %arg0, %c0_i32 : i32, i32
  }
}

</mosaic_0001>

<bundles_post_ra>
// kernel: tpu_custom_call.1
= control target key start
LH: loop header
LB: loop body
LE: loop exit
PB: predicated region body
PF: predicated region fallthrough
CT: control target
= control target key end

     0   :  { %14 = vsyncpa [#allocation3], 0  ;;  %s3028_s0 = inlined_call_operand.hbm [shape: bf16[16,128], index: 0, kind: input, shape index: {}]   ;;  %s3029_s1 = inlined_call_operand.hbm [shape: bf16[128,256], index: 1, kind: input, shape index: {}]   ;;  %s3030_s2 = inlined_call_operand.hbm [shape: f32[1,256], index: 2, kind: input, shape index: {}]   ;;  %s3031_s3 = inlined_call_operand.hbm [shape: bf16[3,256,256], index: 3, kind: input, shape index: {}]   ;;  %s3032_s4 = inlined_call_operand.vmem [shape: f32[3,1,256], index: 4, kind: input, shape index: {}]   ;;  %s3033_s5 = inlined_call_operand.hbm [shape: bf16[3,256,256], index: 5, kind: input, shape index: {}]   ;;  %s3034_s6 = inlined_call_operand.hbm [shape: f32[3,1,256], index: 6, kind: input, shape index: {}]   ;;  %s3035_s7 = inlined_call_operand.hbm [shape: bf16[256,128], index: 7, kind: input, shape index: {}]   ;;  %s3036_s8 = inlined_call_operand.vmem [shape: f32[1,128], index: 8, kind: input, shape index: {}]   ;;  %s3037_s9 = inlined_call_operand.hbm [shape: bf16[16,128], index: 9, kind: output, shape index: {}]  }
   0x1   :  { %15 = vsyncpa [#allocation6], 0 }
   0x2   :  { %16 = vsyncpa [#allocation9], 0 }
   0x3   :  { %17 = vsyncpa [#allocation12], 0 }
   0x4   :  { %18 = vsyncpa [#allocation4], 0  ;;  %s2831_s30 = smov [#allocation5]  }
   0x5   :  { %s36_s10 = sshll.u32 %s2831_s30, 4  ;;  %s37_s10 = int_to_ptr.vmem [resolvable:$true] %s36_s10 }
   0x6   :  { %s2669_s11 = scalar_lea.vmem %s37_s10, 2048  ;;  %p2674_p1 = scmp.lt.s32.totalorder %s37_s10, %s37_s10 }
   0x7   :  { %p2670_p0 = scmp.ne.s32.totalorder %s37_s10, %s2669_s11  ;;  %p2675_p2 = scmp.lt.s32.totalorder %s2669_s11, %s2669_s11 }
   0x9   :  { %p2676_p3 = por %p2675_p2, %p2674_p1 }
   0xb   :  { %p2677_p4 = pnand %p2676_p3, %p2670_p0 }
   0xd   :  { %2680 = shalt.err (!%p2677_p4)
}
   0xe   :  { %s2832_s12 = smov 128   ;;  %s2833_s13 = smov 8  }
   0xf   :  { %42 = dma.hbm_to_vmem [thread:$0]  %s3029_s1, 2048, %s37_s10, [#allocation6], %s2832_s12, %s2832_s12, %s2833_s13  }
  0x10   :  { %s2834_s16 = smov [#allocation8]   ;;  %s2835_s18 = smov [#allocation11]  }
  0x11   :  { %s58_s17 = sshll.u32 %s2834_s16, 4  ;;  %s84_s19 = sshll.u32 %s2835_s18, 4  ;;  %s59_s17 = int_to_ptr.vmem [resolvable:$true] %s58_s17  ;;  %s85_s19 = int_to_ptr.vmem [resolvable:$true] %s84_s19 }
  0x12   :  { %s2689_s20 = scalar_lea.vmem %s59_s17, 12288  ;;  %p2694_p6 = scmp.lt.s32.totalorder %s59_s17, %s59_s17 }
  0x13   :  { %p2690_p5 = scmp.ne.s32.totalorder %s59_s17, %s2689_s20  ;;  %p2695_p7 = scmp.lt.s32.totalorder %s2689_s20, %s2689_s20 }
  0x15   :  { %p2696_p8 = por %p2695_p7, %p2694_p6 }
  0x17   :  { %p2697_p9 = pnand %p2696_p8, %p2690_p5 }
  0x19   :  { %2700 = shalt.err (!%p2697_p9)
}
  0x1a   :  { %64 = dma.hbm_to_vmem [thread:$0]  %s3031_s3, 12288, %s59_s17, [#allocation9], %s2832_s12, %s2832_s12, %s2833_s13  }
  0x1b   :  { %s2709_s1 = scalar_lea.vmem %s85_s19, 96  ;;  %p2714_p11 = scmp.lt.s32.totalorder %s85_s19, %s85_s19 }
  0x1c   :  { %p2710_p10 = scmp.ne.s32.totalorder %s85_s19, %s2709_s1  ;;  %p2715_p12 = scmp.lt.s32.totalorder %s2709_s1, %s2709_s1 }
  0x1e   :  { %p2716_p13 = por %p2715_p12, %p2714_p11 }
  0x20   :  { %p2717_p0 = pnand %p2716_p13, %p2710_p10 }
  0x22   :  { %2720 = shalt.err (!%p2717_p0)
}
  0x23   :  { %s2836_s23 = smov 32   ;;  %s2837_s24 = smov 2  }
  0x24   :  { %90 = dma.hbm_to_vmem [thread:$0]  %s3034_s6, 96, %s85_s19, [#allocation12], %s2836_s23, %s2836_s23, %s2837_s24  }
  0x25   :  { %s2838_s27 = smov [#allocation2]  }
  0x26   :  { %s24_s28 = sshll.u32 %s2838_s27, 4  ;;  %s25_s28 = int_to_ptr.vmem [resolvable:$true] %s24_s28 }
  0x27   :  { %s2729_s29 = scalar_lea.vmem %s25_s28, 128  ;;  %p2734_p2 = scmp.lt.s32.totalorder %s25_s28, %s25_s28 }
  0x28   :  { %p2730_p1 = scmp.ne.s32.totalorder %s25_s28, %s2729_s29  ;;  %p2735_p3 = scmp.lt.s32.totalorder %s2729_s29, %s2729_s29 }
  0x2a   :  { %p2736_p4 = por %p2735_p3, %p2734_p2 }
  0x2c   :  { %p2737_p5 = pnand %p2736_p4, %p2730_p1 }
  0x2e   :  { %2740 = shalt.err (!%p2737_p5)
}
  0x2f   :  { %s2839_s3 = smov 64   ;;  %s2840_s30 = smov 4  }
  0x30   :  { %30 = dma.hbm_to_vmem [thread:$0]  %s3028_s0, 128, %s25_s28, [#allocation3], %s2839_s3, %s2839_s3, %s2840_s30  }
  0x31   :  { %s2841_s6 = smov [#allocation7]   ;;  %s2842_s15 = smov [#allocation10]  }
  0x32   :  { %s49_s14 = sshll.u32 %s2841_s6, 4  ;;  %s72_s16 = sshll.u32 %s2842_s15, 4  ;;  %s50_s14 = int_to_ptr.vmem [resolvable:$true] %s49_s14  ;;  %s73_s16 = int_to_ptr.vmem [resolvable:$true] %s72_s16 }
  0x33   :  { %s2749_s17 = scalar_lea.vmem %s50_s14, 32  ;;  %p2754_p7 = scmp.lt.s32.totalorder %s50_s14, %s50_s14 }
  0x34   :  { %p2750_p6 = scmp.ne.s32.totalorder %s50_s14, %s2749_s17  ;;  %p2755_p8 = scmp.lt.s32.totalorder %s2749_s17, %s2749_s17 }
  0x36   :  { %p2756_p9 = por %p2755_p8, %p2754_p7 }
  0x38   :  { %p2757_p10 = pnand %p2756_p9, %p2750_p6 }
  0x3a   :  { %2760 = shalt.err (!%p2757_p10)
}
  0x3b   :  { %52 = dma.hbm_to_vmem [thread:$0]  %s3030_s2, 32, %s50_s14, [#allocation6]  }
  0x3c   :  { %s2769_s20 = scalar_lea.vmem %s73_s16, 12288  ;;  %p2774_p12 = scmp.lt.s32.totalorder %s73_s16, %s73_s16 }
  0x3d   :  { %p2770_p11 = scmp.ne.s32.totalorder %s73_s16, %s2769_s20  ;;  %p2775_p13 = scmp.lt.s32.totalorder %s2769_s20, %s2769_s20 }
  0x3f   :  { %p2776_p0 = por %p2775_p13, %p2774_p12 }
  0x41   :  { %p2777_p1 = pnand %p2776_p0, %p2770_p11 }
  0x43   :  { %2780 = shalt.err (!%p2777_p1)
}
  0x44   :  { %78 = dma.hbm_to_vmem [thread:$0]  %s3033_s5, 12288, %s73_s16, [#allocation9], %s2832_s12, %s2832_s12, %s2833_s13  }
  0x45   :  { %s2843_s22 = smov [#allocation13]  }
  0x46   :  { %s96_s1 = sshll.u32 %s2843_s22, 4  ;;  %s97_s1 = int_to_ptr.vmem [resolvable:$true] %s96_s1 }
  0x47   :  { %s2789_s23 = scalar_lea.vmem %s97_s1, 2048  ;;  %p2794_p3 = scmp.lt.s32.totalorder %s97_s1, %s97_s1 }
  0x48   :  { %p2790_p2 = scmp.ne.s32.totalorder %s97_s1, %s2789_s23  ;;  %p2795_p4 = scmp.lt.s32.totalorder %s2789_s23, %s2789_s23 }
  0x4a   :  { %p2796_p5 = por %p2795_p4, %p2794_p3 }
  0x4c   :  { %p2797_p6 = pnand %p2796_p5, %p2790_p2 }
  0x4e   :  { %2800 = shalt.err (!%p2797_p6)
}
  0x4f   :  { %102 = dma.hbm_to_vmem [thread:$0]  %s3035_s7, 2048, %s97_s1, [#allocation12], %s2839_s3, %s2839_s3, %s2840_s30  }
  0x50   :  { %2821 = dma.done.wait [#allocation3], 128  }
  0x51   :  { %2822 = vsyncadd [#allocation3], 4294967168 }
  0x52   :  { %2823 = dma.done.wait [#allocation6], 2080  }
  0x53   :  { %2824 = vsyncadd [#allocation6], 4294965216 }
  0x54   :  { %2825 = dma.done.wait [#allocation9], 24576  }
  0x55   :  { %2826 = vsyncadd [#allocation9], 4294942720 }
  0x56   :  { %2827 = dma.done.wait [#allocation12], 2144  }
  0x57   :  { %2828 = vsyncadd [#allocation12], 4294965152  ;;  %v2844_v0 = vmov 0   ;;  %v2324_v1 = vld [vmem:[#allocation5 + $0x74] ss:$8 sps:$4 sm:$0xff]   ;;  %s2845_s28 = smov [#allocation14]  }
  0x58   :  { %275 = vmatprep.mubr.bf16.mxu0 %v2844_v0  ;;  %v2326_v2 = vld [vmem:[#allocation5 + $0x70] ss:$8 sps:$4 sm:$0xff]   ;;  %243 = vmatprep.subr.bf16.mxu0 %v2324_v1  ;;  %v2327_v3 = vld [vmem:[#allocation5 + $0x64] ss:$8 sps:$4 sm:$0xff]   ;;  %v2329_v4 = vld [vmem:[#allocation5 + $0x60] ss:$8 sps:$4 sm:$0xff]  }
  0x59   :  { %244 = vmatpush1.bf16.msra.mxu0 %v2326_v2  ;;  %v2330_v5 = vld [vmem:[#allocation5 + $0x54] ss:$8 sps:$4 sm:$0xff]   ;;  %v2332_v6 = vld [vmem:[#allocation5 + $0x50] ss:$8 sps:$4 sm:$0xff]   ;;  %v2333_v7 = vld [vmem:[#allocation5 + $0x44] ss:$8 sps:$4 sm:$0xff]  }
  0x5a   :  { %245 = vmatprep.subr.bf16.mxu0 %v2327_v3  ;;  %v2335_v8 = vld [vmem:[#allocation5 + $0x40] ss:$8 sps:$4 sm:$0xff]   ;;  %v2336_v9 = vld [vmem:[#allocation5 + $0x34] ss:$8 sps:$4 sm:$0xff]   ;;  %v2338_v13 = vld [vmem:[#allocation5 + $0x30] ss:$8 sps:$4 sm:$0xff]  }
  0x5b   :  { %v2349_v10 = vld [vmem:[#allocation8 + $0x74] ss:$8 sps:$4 sm:$0xff]   ;;  %v2351_v11 = vld [vmem:[#allocation8 + $0x70] ss:$8 sps:$4 sm:$0xff]   ;;  %v2352_v12 = vld [vmem:[#allocation8 + $0x64] ss:$8 sps:$4 sm:$0xff]  }
  0x5c   :  { %496 = vmatprep.subr.bf16.mxu1 %v2349_v10  ;;  %v2354_v14 = vld [vmem:[#allocation8 + $0x60] ss:$8 sps:$4 sm:$0xff]   ;;  %v2355_v16 = vld [vmem:[#allocation8 + $0x54] ss:$8 sps:$4 sm:$0xff]   ;;  %v2357_v18 = vld [vmem:[#allocation8 + $0x50] ss:$8 sps:$4 sm:$0xff]  }
  0x5d   :  { %246 = vmatpush1.bf16.msra.mxu0 %v2329_v4  ;;  %497 = vmatpush1.bf16.msra.mxu1 %v2351_v11  ;;  %v2339_v15 = vld [vmem:[#allocation5 + $0x24] ss:$8 sps:$4 sm:$0xff]   ;;  %v2341_v17 = vld [vmem:[#allocation5 + $0x20] ss:$8 sps:$4 sm:$0xff]   ;;  %v2342_v19 = vld [vmem:[#allocation5 + $0x14] ss:$8 sps:$4 sm:$0xff]  }
  0x5e   :  { %247 = vmatprep.subr.bf16.mxu0 %v2330_v5  ;;  %498 = vmatprep.subr.bf16.mxu1 %v2352_v12  ;;  %v2358_v20 = vld [vmem:[#allocation8 + $0x44] ss:$8 sps:$4 sm:$0xff]   ;;  %v2360_v22 = vld [vmem:[#allocation8 + $0x40] ss:$8 sps:$4 sm:$0xff]   ;;  %v2361_v24 = vld [vmem:[#allocation8 + $0x34] ss:$8 sps:$4 sm:$0xff]   ;;  %v147_v12 = vlaneseq }
  0x5f   :  { %v2344_v21 = vld [vmem:[#allocation5 + $0x10] ss:$8 sps:$4 sm:$0xff]   ;;  %v2345_v23 = vld [vmem:[#allocation5 + $0x4] ss:$8 sps:$4 sm:$0xff]   ;;  %v2347_v25 = vld [vmem:[#allocation5] ss:$8 sps:$4 sm:$0xff]  }
  0x60   :  { %v2363_v26 = vld [vmem:[#allocation8 + $0x30] ss:$8 sps:$4 sm:$0xff]   ;;  %v2364_v28 = vld [vmem:[#allocation8 + $0x24] ss:$8 sps:$4 sm:$0xff]   ;;  %v2366_v29 = vld [vmem:[#allocation8 + $0x20] ss:$8 sps:$4 sm:$0xff]  }
  0x61   :  { %248 = vmatpush1.bf16.msra.mxu0 %v2332_v6  ;;  %499 = vmatpush1.bf16.msra.mxu1 %v2354_v14  ;;  %v2348_v27 = vld [vmem:[#allocation2] sm:$0xff]   ;;  %v2370_v32 = vld [vmem:[#allocation8 + $0x4] ss:$8 sps:$4 sm:$0xff]   ;;  %v2372_v33 = vld [vmem:[#allocation8] ss:$8 sps:$4 sm:$0xff]   ;;  %s2033_s29 = sshll.u32 %s2845_s28, 4  ;;  %s2034_s29 = int_to_ptr.vmem [resolvable:$true] %s2033_s29 }
  0x62   :  { %249 = vmatprep.subr.bf16.mxu0 %v2333_v7  ;;  %500 = vmatprep.subr.bf16.mxu1 %v2355_v16  ;;  %v2367_v30 = vld [vmem:[#allocation8 + $0x14] ss:$8 sps:$4 sm:$0xff]   ;;  %v2369_v31 = vld [vmem:[#allocation8 + $0x10] ss:$8 sps:$4 sm:$0xff]   ;;  %v2376_v36 = vld [vmem:[#allocation8 + $0xe4] ss:$8 sps:$4 sm:$0xff]   ;;  %p2806_p8 = scmp.lt.s32.totalorder %s2034_s29, %s2034_s29 }
  0x63   :  { %v2373_v34 = vld [vmem:[#allocation8 + $0xf4] ss:$8 sps:$4 sm:$0xff]   ;;  %v2375_v35 = vld [vmem:[#allocation8 + $0xf0] ss:$8 sps:$4 sm:$0xff]   ;;  %v2378_v37 = vld [vmem:[#allocation8 + $0xe0] ss:$8 sps:$4 sm:$0xff]  }
  0x64   :  { %v2379_v38 = vld [vmem:[#allocation8 + $0xd4] ss:$8 sps:$4 sm:$0xff]   ;;  %v2381_v39 = vld [vmem:[#allocation8 + $0xd0] ss:$8 sps:$4 sm:$0xff]   ;;  %v2382_v40 = vld [vmem:[#allocation8 + $0xc4] ss:$8 sps:$4 sm:$0xff]  }
  0x65   :  { %250 = vmatpush1.bf16.msra.mxu0 %v2335_v8  ;;  %501 = vmatpush1.bf16.msra.mxu1 %v2357_v18  ;;  %v2384_v41 = vld [vmem:[#allocation8 + $0xc0] ss:$8 sps:$4 sm:$0xff]   ;;  %v2385_v42 = vld [vmem:[#allocation8 + $0xb4] ss:$8 sps:$4 sm:$0xff]   ;;  %v2387_v43 = vld [vmem:[#allocation8 + $0xb0] ss:$8 sps:$4 sm:$0xff]  }
  0x66   :  { %251 = vmatprep.subr.bf16.mxu0 %v2336_v9  ;;  %502 = vmatprep.subr.bf16.mxu1 %v2358_v20  ;;  %v2388_v44 = vld [vmem:[#allocation8 + $0xa4] ss:$8 sps:$4 sm:$0xff]   ;;  %v2390_v45 = vld [vmem:[#allocation8 + $0xa0] ss:$8 sps:$4 sm:$0xff]   ;;  %v2391_v46 = vld [vmem:[#allocation8 + $0x94] ss:$8 sps:$4 sm:$0xff]  }
  0x67   :  { %v2393_v47 = vld [vmem:[#allocation8 + $0x90] ss:$8 sps:$4 sm:$0xff]   ;;  %v2394_v48 = vld [vmem:[#allocation8 + $0x84] ss:$8 sps:$4 sm:$0xff]   ;;  %v2396_v49 = vld [vmem:[#allocation8 + $0x80] ss:$8 sps:$4 sm:$0xff]  }
  0x68   :  { %v2397_v50 = vld [vmem:[#allocation10 + $0x70] ss:$8 sps:$4 sm:$0xff]   ;;  %v2399_v51 = vld [vmem:[#allocation10 + $0x74] ss:$8 sps:$4 sm:$0xff]   ;;  %v2402_v52 = vld [vmem:[#allocation10 + $0x64] ss:$8 sps:$4 sm:$0xff]  }
  0x69   :  { %252 = vmatpush1.bf16.msra.mxu0 %v2338_v13  ;;  %503 = vmatpush1.bf16.msra.mxu1 %v2360_v22  ;;  %v2400_v53 = vld [vmem:[#allocation10 + $0x60] ss:$8 sps:$4 sm:$0xff]   ;;  %v2405_v54 = vld [vmem:[#allocation10 + $0x54] ss:$8 sps:$4 sm:$0xff]   ;;  %v2403_v55 = vld [vmem:[#allocation10 + $0x50] ss:$8 sps:$4 sm:$0xff]  }
  0x6a   :  { %253 = vmatprep.subr.bf16.mxu0 %v2339_v15  ;;  %504 = vmatprep.subr.bf16.mxu1 %v2361_v24  ;;  %v2408_v56 = vld [vmem:[#allocation10 + $0x44] ss:$8 sps:$4 sm:$0xff]   ;;  %v2406_v57 = vld [vmem:[#allocation10 + $0x40] ss:$8 sps:$4 sm:$0xff]   ;;  %v2411_v58 = vld [vmem:[#allocation10 + $0x34] ss:$8 sps:$4 sm:$0xff]  }
  0x6b   :  { %v2409_v59 = vld [vmem:[#allocation10 + $0x30] ss:$8 sps:$4 sm:$0xff]   ;;  %v2414_v60 = vld [vmem:[#allocation10 + $0x24] ss:$8 sps:$4 sm:$0xff]   ;;  %v2412_v61 = vld [vmem:[#allocation10 + $0x20] ss:$8 sps:$4 sm:$0xff]  }
  0x6c   :  { %v2417_v62 = vld [vmem:[#allocation10 + $0x14] ss:$8 sps:$4 sm:$0xff]   ;;  %v2415_v63 = vld [vmem:[#allocation10 + $0x10] ss:$8 sps:$4 sm:$0xff]   ;;  %v2420_v0 = vld [vmem:[#allocation10 + $0x4] ss:$8 sps:$4 sm:$0xff]  }
  0x6d   :  { %254 = vmatpush1.bf16.msra.mxu0 %v2341_v17  ;;  %505 = vmatpush1.bf16.msra.mxu1 %v2363_v26  ;;  %v2418_v1 = vld [vmem:[#allocation10] ss:$8 sps:$4 sm:$0xff]   ;;  %v2423_v2 = vld [vmem:[#allocation10 + $0xf4] ss:$8 sps:$4 sm:$0xff]   ;;  %v2421_v3 = vld [vmem:[#allocation10 + $0xf0] ss:$8 sps:$4 sm:$0xff]  }
  0x6e   :  { %255 = vmatprep.subr.bf16.mxu0 %v2342_v19  ;;  %506 = vmatprep.subr.bf16.mxu1 %v2364_v28  ;;  %v2426_v4 = vld [vmem:[#allocation10 + $0xe4] ss:$8 sps:$4 sm:$0xff]   ;;  %v2424_v5 = vld [vmem:[#allocation10 + $0xe0] ss:$8 sps:$4 sm:$0xff]   ;;  %v2429_v6 = vld [vmem:[#allocation10 + $0xd4] ss:$8 sps:$4 sm:$0xff]  }
  0x6f   :  { %v2427_v7 = vld [vmem:[#allocation10 + $0xd0] ss:$8 sps:$4 sm:$0xff]   ;;  %v2432_v8 = vld [vmem:[#allocation10 + $0xc4] ss:$8 sps:$4 sm:$0xff]   ;;  %v2430_v9 = vld [vmem:[#allocation10 + $0xc0] ss:$8 sps:$4 sm:$0xff]  }
  0x70   :  { %v2435_v10 = vld [vmem:[#allocation10 + $0xb4] ss:$8 sps:$4 sm:$0xff]   ;;  %v2433_v11 = vld [vmem:[#allocation10 + $0xb0] ss:$8 sps:$4 sm:$0xff]   ;;  %v148_v13 = vshrl.u32 %v147_v12, 7 }
  0x71   :  { %256 = vmatpush1.bf16.msra.mxu0 %v2344_v21  ;;  %507 = vmatpush1.bf16.msra.mxu1 %v2366_v29  ;;  %v145_v16 = vld [vmem:[#allocation7] sm:$0x3] }
  0x72   :  { %257 = vmatprep.subr.bf16.mxu0 %v2345_v23  ;;  %508 = vmatprep.subr.bf16.mxu1 %v2367_v30  ;;  %v2932_v14 = vsub.s32 1, %v148_v13  ;;  %v2934_v15 = vsub.s32 0, %v148_v13 }
  0x74   :  { %v154_v18 = vrot.slane %v145_v16, %v2932_v14  ;;  %v150_v19 = vrot.slane %v145_v16, %v2934_v15 }
  0x75   :  { %258 = vmatpush1.bf16.msra.mxu0 %v2347_v25  ;;  %509 = vmatpush1.bf16.msra.mxu1 %v2369_v31 }
  0x76   :  { %510 = vmatprep.subr.bf16.mxu1 %v2370_v32  ;;  %749 = vmatprep.subr.bf16.mxu0 %v2399_v51  ;;  %v2465_v51 = vld [vmem:[#allocation8 + $0x114] ss:$8 sps:$4 sm:$0xff]  }
  0x78   :  { %276 = vmatmul.mubr.bf16.vlgmr.msra.gmra.mxu0 %v2348_v27 }
  0x79   :  { %511 = vmatpush1.bf16.msra.mxu1 %v2372_v33  ;;  %750 = vmatpush1.bf16.msra.mxu0 %v2397_v50  ;;  %v2438_v33 = vld [vmem:[#allocation10 + $0xa4] ss:$8 sps:$4 sm:$0xff]   ;;  %v2460_v50 = vld [vmem:[#allocation8 + $0x120] ss:$8 sps:$4 sm:$0xff]  }
  0x7a   :  { %512 = vmatprep.subr.bf16.mxu1 %v2373_v34  ;;  %751 = vmatprep.subr.bf16.mxu0 %v2402_v52  ;;  %v2436_v34 = vld [vmem:[#allocation10 + $0xa0] ss:$8 sps:$4 sm:$0xff]   ;;  %v2463_v52 = vld [vmem:[#allocation8 + $0x110] ss:$8 sps:$4 sm:$0xff]  }
  0x7d   :  { %513 = vmatpush2.bf16.msra.mxu1 %v2375_v35  ;;  %752 = vmatpush1.bf16.msra.mxu0 %v2400_v53  ;;  %v2441_v35 = vld [vmem:[#allocation10 + $0x94] ss:$8 sps:$4 sm:$0xff]   ;;  %v2468_v53 = vld [vmem:[#allocation8 + $0x104] ss:$8 sps:$4 sm:$0xff]  }
  0x7e   :  { %514 = vmatprep.subr.bf16.mxu1 %v2376_v36  ;;  %753 = vmatprep.subr.bf16.mxu0 %v2405_v54  ;;  %v2439_v36 = vld [vmem:[#allocation10 + $0x90] ss:$8 sps:$4 sm:$0xff]   ;;  %v2466_v54 = vld [vmem:[#allocation8 + $0x100] ss:$8 sps:$4 sm:$0xff]  }
  0x81   :  { %515 = vmatpush2.bf16.msra.mxu1 %v2378_v37  ;;  %754 = vmatpush1.bf16.msra.mxu0 %v2403_v55  ;;  %v2444_v37 = vld [vmem:[#allocation10 + $0x84] ss:$8 sps:$4 sm:$0xff]   ;;  %v2471_v55 = vld [vmem:[#allocation8 + $0x1f4] ss:$8 sps:$4 sm:$0xff]  }
  0x82   :  { %516 = vmatprep.subr.bf16.mxu1 %v2379_v38  ;;  %755 = vmatprep.subr.bf16.mxu0 %v2408_v56  ;;  %v2442_v38 = vld [vmem:[#allocation10 + $0x80] ss:$8 sps:$4 sm:$0xff]   ;;  %v2469_v56 = vld [vmem:[#allocation8 + $0x1f0] ss:$8 sps:$4 sm:$0xff]  }
  0x85   :  { %517 = vmatpush2.bf16.msra.mxu1 %v2381_v39  ;;  %756 = vmatpush1.bf16.msra.mxu0 %v2406_v57  ;;  %v2445_v39 = vld [vmem:[#allocation8 + $0x170] ss:$8 sps:$4 sm:$0xff]   ;;  %v2474_v57 = vld [vmem:[#allocation8 + $0x1e4] ss:$8 sps:$4 sm:$0xff]  }
  0x86   :  { %518 = vmatprep.subr.bf16.mxu1 %v2382_v40  ;;  %757 = vmatprep.subr.bf16.mxu0 %v2411_v58  ;;  %v2447_v40 = vld [vmem:[#allocation8 + $0x174] ss:$8 sps:$4 sm:$0xff]   ;;  %v2472_v58 = vld [vmem:[#allocation8 + $0x1e0] ss:$8 sps:$4 sm:$0xff]  }
  0x89   :  { %519 = vmatpush2.bf16.msra.mxu1 %v2384_v41  ;;  %758 = vmatpush1.bf16.msra.mxu0 %v2409_v59  ;;  %v2450_v41 = vld [vmem:[#allocation8 + $0x164] ss:$8 sps:$4 sm:$0xff]   ;;  %v2477_v59 = vld [vmem:[#allocation8 + $0x1d4] ss:$8 sps:$4 sm:$0xff]  }
  0x8a   :  { %520 = vmatprep.subr.bf16.mxu1 %v2385_v42  ;;  %759 = vmatprep.subr.bf16.mxu0 %v2414_v60  ;;  %v2448_v42 = vld [vmem:[#allocation8 + $0x160] ss:$8 sps:$4 sm:$0xff]   ;;  %v2475_v60 = vld [vmem:[#allocation8 + $0x1d0] ss:$8 sps:$4 sm:$0xff]  }
  0x8d   :  { %521 = vmatpush2.bf16.msra.mxu1 %v2387_v43  ;;  %760 = vmatpush1.bf16.msra.mxu0 %v2412_v61  ;;  %v2453_v43 = vld [vmem:[#allocation8 + $0x154] ss:$8 sps:$4 sm:$0xff]   ;;  %v2480_v61 = vld [vmem:[#allocation8 + $0x1c4] ss:$8 sps:$4 sm:$0xff]  }
  0x8e   :  { %522 = vmatprep.subr.bf16.mxu1 %v2388_v44  ;;  %761 = vmatprep.subr.bf16.mxu0 %v2417_v62  ;;  %v2451_v44 = vld [vmem:[#allocation8 + $0x150] ss:$8 sps:$4 sm:$0xff]   ;;  %v2478_v62 = vld [vmem:[#allocation8 + $0x1c0] ss:$8 sps:$4 sm:$0xff]  }
  0x91   :  { %523 = vmatpush2.bf16.msra.mxu1 %v2390_v45  ;;  %762 = vmatpush1.bf16.msra.mxu0 %v2415_v63  ;;  %v2456_v45 = vld [vmem:[#allocation8 + $0x144] ss:$8 sps:$4 sm:$0xff]   ;;  %v324_v63 = vld [vmem:[%s3032_s4] sm:$0x3] }
  0x92   :  { %524 = vmatprep.subr.bf16.mxu1 %v2391_v46  ;;  %763 = vmatprep.subr.bf16.mxu0 %v2420_v0  ;;  %v2454_v46 = vld [vmem:[#allocation8 + $0x140] ss:$8 sps:$4 sm:$0xff]  }
  0x95   :  { %525 = vmatpush2.bf16.msra.mxu1 %v2393_v47  ;;  %764 = vmatpush1.bf16.msra.mxu0 %v2418_v1  ;;  %v2459_v47 = vld [vmem:[#allocation8 + $0x134] ss:$8 sps:$4 sm:$0xff]   ;;  %v333_v1 = vrot.slane %v324_v63, %v2932_v14 }
  0x96   :  { %526 = vmatprep.subr.bf16.mxu1 %v2394_v48  ;;  %765 = vmatprep.subr.bf16.mxu0 %v2423_v2  ;;  %v2457_v48 = vld [vmem:[#allocation8 + $0x130] ss:$8 sps:$4 sm:$0xff]   ;;  %v329_v2 = vrot.slane %v324_v63, %v2934_v15 }
  0x99   :  { %527 = vmatpush2.bf16.msra.mxu1 %v2396_v49  ;;  %766 = vmatpush2.bf16.msra.mxu0 %v2421_v3  ;;  %v2462_v49 = vld [vmem:[#allocation8 + $0x124] ss:$8 sps:$4 sm:$0xff]  }
  0x9a   :  { %767 = vmatprep.subr.bf16.mxu0 %v2426_v4  ;;  %1008 = vmatprep.subr.bf16.mxu1 %v2447_v40  ;;  %v2504_v40 = vld [vmem:[#allocation10 + $0x144] ss:$8 sps:$4 sm:$0xff]  }
  0x9d   :  { %768 = vmatpush2.bf16.msra.mxu0 %v2424_v5 }
  0x9e   :  { %769 = vmatprep.subr.bf16.mxu0 %v2429_v6 }
  0xa1   :  { %770 = vmatpush2.bf16.msra.mxu0 %v2427_v7 }
  0xa2   :  { %771 = vmatprep.subr.bf16.mxu0 %v2432_v8 }
  0xa5   :  { %772 = vmatpush2.bf16.msra.mxu0 %v2430_v9 }
  0xa6   :  { %773 = vmatprep.subr.bf16.mxu0 %v2435_v10 }
  0xa9   :  { %774 = vmatpush2.bf16.msra.mxu0 %v2433_v11 }
  0xaa   :  { %775 = vmatprep.subr.bf16.mxu0 %v2438_v33  ;;  %v2490_v33 = vld [vmem:[#allocation8 + $0x180] ss:$8 sps:$4 sm:$0xff]  }
  0xad   :  { %776 = vmatpush2.bf16.msra.mxu0 %v2436_v34  ;;  %v2493_v34 = vld [vmem:[#allocation10 + $0x170] ss:$8 sps:$4 sm:$0xff]  }
  0xae   :  { %777 = vmatprep.subr.bf16.mxu0 %v2441_v35  ;;  %v2495_v35 = vld [vmem:[#allocation10 + $0x174] ss:$8 sps:$4 sm:$0xff]  }
  0xb1   :  { %778 = vmatpush2.bf16.msra.mxu0 %v2439_v36  ;;  %v2498_v36 = vld [vmem:[#allocation10 + $0x164] ss:$8 sps:$4 sm:$0xff]  }
  0xb2   :  { %779 = vmatprep.subr.bf16.mxu0 %v2444_v37  ;;  %v2496_v37 = vld [vmem:[#allocation10 + $0x160] ss:$8 sps:$4 sm:$0xff]  }
  0xb5   :  { %780 = vmatpush2.bf16.msra.mxu0 %v2442_v38  ;;  %v2501_v38 = vld [vmem:[#allocation10 + $0x154] ss:$8 sps:$4 sm:$0xff]  }
  0xb6   :  { %1263 = vmatprep.subr.bf16.mxu0 %v2495_v35  ;;  %v2558_v35 = vld [vmem:[#allocation8 + $0x224] ss:$8 sps:$4 sm:$0xff]  }
 0x138   :  { %v277_v17 = vpop.f32.mrf.mxu0 }
 0x139   :  { %v2942_v24 = vadd.f32 %v277_v17, %v150_v19 }
 0x13a   :  { %v279_v20 = vpop.f32.mrf.mxu0 }
 0x13b   :  { %v2938_v22 = vadd.f32 %v279_v20, %v154_v18  ;;  %v286_v30 = vmax.f32 %v2942_v24, 0.0  ;;  %v2486_v20 = vld [vmem:[#allocation8 + $0x1a4] ss:$8 sps:$4 sm:$0xff]   ;;  %v2538_v24 = vld [vmem:[#allocation10 + $0x180] ss:$8 sps:$4 sm:$0xff]  }
 0x13c   :  { %v281_v21 = vpop.f32.mrf.mxu0 }
 0x13d   :  { %v2940_v23 = vadd.f32 %v281_v21, %v150_v19  ;;  %v287_v28 = vmax.f32 %v2938_v22, 0.0  ;;  %v2481_v19 = vld [vmem:[#allocation8 + $0x1b0] ss:$8 sps:$4 sm:$0xff]   ;;  %v2484_v21 = vld [vmem:[#allocation8 + $0x1a0] ss:$8 sps:$4 sm:$0xff]  }
 0x13e   :  { %v283_v25 = vpop.f32.mrf.mxu0  ;;  %v2532_v22 = vld [vmem:[#allocation10 + $0x1a0] ss:$8 sps:$4 sm:$0xff]  }
 0x13f   :  { %v2944_v26 = vadd.f32 %v283_v25, %v154_v18  ;;  %v288_v27 = vmax.f32 %v2940_v23, 0.0  ;;  %v2483_v18 = vld [vmem:[#allocation8 + $0x1b4] ss:$8 sps:$4 sm:$0xff]  }
 0x140   :  { %v2489_v25 = vld [vmem:[#allocation8 + $0x194] ss:$8 sps:$4 sm:$0xff]  }
 0x141   :  { %v289_v29 = vmax.f32 %v2944_v26, 0.0  ;;  %v290_v32 = vpack.c.bf16 %v288_v27, %v286_v30  ;;  %v2535_v26 = vld [vmem:[#allocation10 + $0x190] ss:$8 sps:$4 sm:$0xff]  }
 0x143   :  { %v291_v31 = vpack.c.bf16 %v289_v29, %v287_v28 }
 0x145   :  { %528 = vmatprep.mubr.bf16.mxu1 %v291_v31  ;;  %v2487_v31 = vld [vmem:[#allocation8 + $0x190] ss:$8 sps:$4 sm:$0xff]  }
 0x146   :  { %529 = vmatmul.mubr.bf16.vlgmr.msra.gmra.mxu1 %v290_v32  ;;  %v2492_v32 = vld [vmem:[#allocation8 + $0x184] ss:$8 sps:$4 sm:$0xff]  }
 0x147   :  { %1009 = vmatpush1.bf16.msra.mxu1 %v2445_v39  ;;  %v2499_v39 = vld [vmem:[#allocation10 + $0x150] ss:$8 sps:$4 sm:$0xff]  }
 0x148   :  { %1010 = vmatprep.subr.bf16.mxu1 %v2450_v41  ;;  %v2502_v41 = vld [vmem:[#allocation10 + $0x140] ss:$8 sps:$4 sm:$0xff]  }
 0x14b   :  { %1011 = vmatpush1.bf16.msra.mxu1 %v2448_v42  ;;  %v2507_v42 = vld [vmem:[#allocation10 + $0x134] ss:$8 sps:$4 sm:$0xff]  }
 0x14c   :  { %1012 = vmatprep.subr.bf16.mxu1 %v2453_v43  ;;  %v2505_v43 = vld [vmem:[#allocation10 + $0x130] ss:$8 sps:$4 sm:$0xff]  }
 0x14f   :  { %1013 = vmatpush1.bf16.msra.mxu1 %v2451_v44  ;;  %v2510_v44 = vld [vmem:[#allocation10 + $0x124] ss:$8 sps:$4 sm:$0xff]  }
 0x150   :  { %1014 = vmatprep.subr.bf16.mxu1 %v2456_v45  ;;  %v2508_v45 = vld [vmem:[#allocation10 + $0x120] ss:$8 sps:$4 sm:$0xff]  }
 0x153   :  { %1015 = vmatpush1.bf16.msra.mxu1 %v2454_v46  ;;  %v2513_v46 = vld [vmem:[#allocation10 + $0x114] ss:$8 sps:$4 sm:$0xff]  }
 0x154   :  { %1016 = vmatprep.subr.bf16.mxu1 %v2459_v47  ;;  %v2511_v47 = vld [vmem:[#allocation10 + $0x110] ss:$8 sps:$4 sm:$0xff]  }
 0x157   :  { %1017 = vmatpush1.bf16.msra.mxu1 %v2457_v48  ;;  %v2516_v48 = vld [vmem:[#allocation10 + $0x104] ss:$8 sps:$4 sm:$0xff]  }
 0x158   :  { %1018 = vmatprep.subr.bf16.mxu1 %v2462_v49  ;;  %v2514_v49 = vld [vmem:[#allocation10 + $0x100] ss:$8 sps:$4 sm:$0xff]  }
 0x15b   :  { %1019 = vmatpush1.bf16.msra.mxu1 %v2460_v50  ;;  %v2519_v50 = vld [vmem:[#allocation10 + $0x1f4] ss:$8 sps:$4 sm:$0xff]  }
 0x15c   :  { %1020 = vmatprep.subr.bf16.mxu1 %v2465_v51  ;;  %v2517_v51 = vld [vmem:[#allocation10 + $0x1f0] ss:$8 sps:$4 sm:$0xff]  }
 0x15f   :  { %1021 = vmatpush1.bf16.msra.mxu1 %v2463_v52  ;;  %v2522_v52 = vld [vmem:[#allocation10 + $0x1e4] ss:$8 sps:$4 sm:$0xff]  }
 0x160   :  { %1022 = vmatprep.subr.bf16.mxu1 %v2468_v53  ;;  %v2520_v53 = vld [vmem:[#allocation10 + $0x1e0] ss:$8 sps:$4 sm:$0xff]  }
 0x163   :  { %1023 = vmatpush1.bf16.msra.mxu1 %v2466_v54  ;;  %v2525_v54 = vld [vmem:[#allocation10 + $0x1d4] ss:$8 sps:$4 sm:$0xff]  }
 0x164   :  { %1024 = vmatprep.subr.bf16.mxu1 %v2471_v55  ;;  %v2523_v55 = vld [vmem:[#allocation10 + $0x1d0] ss:$8 sps:$4 sm:$0xff]  }
 0x167   :  { %1025 = vmatpush2.bf16.msra.mxu1 %v2469_v56  ;;  %v2528_v56 = vld [vmem:[#allocation10 + $0x1c4] ss:$8 sps:$4 sm:$0xff]  }
 0x168   :  { %1026 = vmatprep.subr.bf16.mxu1 %v2474_v57  ;;  %v2526_v57 = vld [vmem:[#allocation10 + $0x1c0] ss:$8 sps:$4 sm:$0xff]  }
 0x16b   :  { %1027 = vmatpush2.bf16.msra.mxu1 %v2472_v58  ;;  %v2531_v58 = vld [vmem:[#allocation10 + $0x1b4] ss:$8 sps:$4 sm:$0xff]  }
 0x16c   :  { %1028 = vmatprep.subr.bf16.mxu1 %v2477_v59  ;;  %v2529_v59 = vld [vmem:[#allocation10 + $0x1b0] ss:$8 sps:$4 sm:$0xff]  }
 0x16f   :  { %1029 = vmatpush2.bf16.msra.mxu1 %v2475_v60  ;;  %v577_v60 = vld [vmem:[#allocation11] sm:$0x3] }
 0x170   :  { %1030 = vmatprep.subr.bf16.mxu1 %v2480_v61  ;;  %v586_v61 = vrot.slane %v577_v60, %v2932_v14 }
 0x173   :  { %1031 = vmatpush2.bf16.msra.mxu1 %v2478_v62  ;;  %v582_v62 = vrot.slane %v577_v60, %v2934_v15 }
 0x174   :  { %1032 = vmatprep.subr.bf16.mxu1 %v2483_v18  ;;  %v2543_v18 = vld [vmem:[#allocation8 + $0x274] ss:$8 sps:$4 sm:$0xff]  }
 0x177   :  { %1033 = vmatpush2.bf16.msra.mxu1 %v2481_v19  ;;  %v2546_v19 = vld [vmem:[#allocation8 + $0x264] ss:$8 sps:$4 sm:$0xff]  }
 0x178   :  { %1034 = vmatprep.subr.bf16.mxu1 %v2486_v20  ;;  %v2544_v20 = vld [vmem:[#allocation8 + $0x260] ss:$8 sps:$4 sm:$0xff]  }
 0x17b   :  { %1035 = vmatpush2.bf16.msra.mxu1 %v2484_v21  ;;  %v2549_v21 = vld [vmem:[#allocation8 + $0x254] ss:$8 sps:$4 sm:$0xff]  }
 0x17c   :  { %1036 = vmatprep.subr.bf16.mxu1 %v2489_v25  ;;  %v2547_v25 = vld [vmem:[#allocation8 + $0x250] ss:$8 sps:$4 sm:$0xff]  }
 0x17f   :  { %1037 = vmatpush2.bf16.msra.mxu1 %v2487_v31  ;;  %v2552_v31 = vld [vmem:[#allocation8 + $0x244] ss:$8 sps:$4 sm:$0xff]  }
 0x180   :  { %1038 = vmatprep.subr.bf16.mxu1 %v2492_v32  ;;  %v2550_v32 = vld [vmem:[#allocation8 + $0x240] ss:$8 sps:$4 sm:$0xff]  }
 0x183   :  { %1039 = vmatpush2.bf16.msra.mxu1 %v2490_v33  ;;  %v2555_v33 = vld [vmem:[#allocation8 + $0x234] ss:$8 sps:$4 sm:$0xff]  }
 0x184   :  { %1522 = vmatprep.subr.bf16.mxu1 %v2543_v18  ;;  %v2606_v18 = vld [vmem:[#allocation10 + $0x224] ss:$8 sps:$4 sm:$0xff]  }
 0x206   :  { %v530_v0 = vpop.f32.mrf.mxu1 }
 0x207   :  { %v531_v7 = vadd.f32 %v530_v0, %v329_v2 }
 0x208   :  { %v532_v3 = vpop.f32.mrf.mxu1 }
 0x209   :  { %v533_v5 = vadd.f32 %v532_v3, %v333_v1  ;;  %v539_v13 = vmax.f32 %v531_v7, 0.0 }
 0x20a   :  { %v534_v4 = vpop.f32.mrf.mxu1 }
 0x20b   :  { %v535_v6 = vadd.f32 %v534_v4, %v329_v2  ;;  %v540_v11 = vmax.f32 %v533_v5, 0.0 }
 0x20c   :  { %v536_v8 = vpop.f32.mrf.mxu1 }
 0x20d   :  { %v537_v9 = vadd.f32 %v536_v8, %v333_v1  ;;  %v541_v10 = vmax.f32 %v535_v6, 0.0 }
 0x20f   :  { %v542_v12 = vmax.f32 %v537_v9, 0.0  ;;  %v543_v17 = vpack.c.bf16 %v541_v10, %v539_v13 }
 0x211   :  { %v544_v16 = vpack.c.bf16 %v542_v12, %v540_v11 }
 0x213   :  { %781 = vmatprep.mubr.bf16.mxu0 %v544_v16 }
 0x214   :  { %782 = vmatmul.mubr.bf16.vlgmr.msra.gmra.mxu0 %v543_v17 }
 0x215   :  { %1264 = vmatpush1.bf16.msra.mxu0 %v2493_v34  ;;  %v2553_v34 = vld [vmem:[#allocation8 + $0x230] ss:$8 sps:$4 sm:$0xff]  }
 0x216   :  { %1265 = vmatprep.subr.bf16.mxu0 %v2498_v36  ;;  %v2556_v36 = vld [vmem:[#allocation8 + $0x220] ss:$8 sps:$4 sm:$0xff]  }
 0x219   :  { %1266 = vmatpush1.bf16.msra.mxu0 %v2496_v37  ;;  %v2561_v37 = vld [vmem:[#allocation8 + $0x214] ss:$8 sps:$4 sm:$0xff]  }
 0x21a   :  { %1267 = vmatprep.subr.bf16.mxu0 %v2501_v38  ;;  %v2559_v38 = vld [vmem:[#allocation8 + $0x210] ss:$8 sps:$4 sm:$0xff]  }
 0x21d   :  { %1268 = vmatpush1.bf16.msra.mxu0 %v2499_v39  ;;  %v2564_v39 = vld [vmem:[#allocation8 + $0x204] ss:$8 sps:$4 sm:$0xff]  }
 0x21e   :  { %1269 = vmatprep.subr.bf16.mxu0 %v2504_v40  ;;  %v2562_v40 = vld [vmem:[#allocation8 + $0x200] ss:$8 sps:$4 sm:$0xff]  }
 0x221   :  { %1270 = vmatpush1.bf16.msra.mxu0 %v2502_v41  ;;  %v2567_v41 = vld [vmem:[#allocation8 + $0x2f4] ss:$8 sps:$4 sm:$0xff]  }
 0x222   :  { %1271 = vmatprep.subr.bf16.mxu0 %v2507_v42  ;;  %v2565_v42 = vld [vmem:[#allocation8 + $0x2f0] ss:$8 sps:$4 sm:$0xff]  }
 0x225   :  { %1272 = vmatpush1.bf16.msra.mxu0 %v2505_v43  ;;  %v2570_v43 = vld [vmem:[#allocation8 + $0x2e4] ss:$8 sps:$4 sm:$0xff]  }
 0x226   :  { %1273 = vmatprep.subr.bf16.mxu0 %v2510_v44  ;;  %v2568_v44 = vld [vmem:[#allocation8 + $0x2e0] ss:$8 sps:$4 sm:$0xff]  }
 0x229   :  { %1274 = vmatpush1.bf16.msra.mxu0 %v2508_v45  ;;  %v2573_v45 = vld [vmem:[#allocation8 + $0x2d4] ss:$8 sps:$4 sm:$0xff]  }
 0x22a   :  { %1275 = vmatprep.subr.bf16.mxu0 %v2513_v46  ;;  %v2571_v46 = vld [vmem:[#allocation8 + $0x2d0] ss:$8 sps:$4 sm:$0xff]  }
 0x22d   :  { %1276 = vmatpush1.bf16.msra.mxu0 %v2511_v47  ;;  %v2576_v47 = vld [vmem:[#allocation8 + $0x2c4] ss:$8 sps:$4 sm:$0xff]  }
 0x22e   :  { %1277 = vmatprep.subr.bf16.mxu0 %v2516_v48  ;;  %v2574_v48 = vld [vmem:[#allocation8 + $0x2c0] ss:$8 sps:$4 sm:$0xff]  }
 0x231   :  { %1278 = vmatpush1.bf16.msra.mxu0 %v2514_v49  ;;  %v2129_v49 = vld [vmem:[%s3032_s4 + $0x2] sm:$0x3] }
 0x232   :  { %1279 = vmatprep.subr.bf16.mxu0 %v2519_v50 }
 0x235   :  { %1280 = vmatpush2.bf16.msra.mxu0 %v2517_v51  ;;  %v845_v51 = vrot.slane %v2129_v49, %v2932_v14 }
 0x236   :  { %1281 = vmatprep.subr.bf16.mxu0 %v2522_v52  ;;  %v841_v52 = vrot.slane %v2129_v49, %v2934_v15 }
 0x239   :  { %1282 = vmatpush2.bf16.msra.mxu0 %v2520_v53 }
 0x23a   :  { %1283 = vmatprep.subr.bf16.mxu0 %v2525_v54 }
 0x23d   :  { %1284 = vmatpush2.bf16.msra.mxu0 %v2523_v55 }
 0x23e   :  { %1285 = vmatprep.subr.bf16.mxu0 %v2528_v56 }
 0x241   :  { %1286 = vmatpush2.bf16.msra.mxu0 %v2526_v57 }
 0x242   :  { %1287 = vmatprep.subr.bf16.mxu0 %v2531_v58 }
 0x245   :  { %1288 = vmatpush2.bf16.msra.mxu0 %v2529_v59 }
 0x2d4   :  { %v783_v63 = vpop.f32.mrf.mxu0 }
 0x2d5   :  { %v784_v2 = vadd.f32 %v783_v63, %v582_v62 }
 0x2d6   :  { %v785_v0 = vpop.f32.mrf.mxu0 }
 0x2d7   :  { %v786_v1 = vadd.f32 %v785_v0, %v586_v61  ;;  %v792_v9 = vmax.f32 %v784_v2, 0.0  ;;  %v2579_v2 = vld [vmem:[#allocation8 + $0x2b4] ss:$8 sps:$4 sm:$0xff]  }
 0x2d8   :  { %v787_v3 = vpop.f32.mrf.mxu0 }
 0x2d9   :  { %v788_v4 = vadd.f32 %v787_v3, %v582_v62  ;;  %v793_v6 = vmax.f32 %v786_v1, 0.0  ;;  %v2979_v16 = vadd.f32 %v792_v9, %v286_v30  ;;  %v2541_v30 = vld [vmem:[#allocation8 + $0x270] ss:$8 sps:$4 sm:$0xff]   ;;  %v2586_v9 = vld [vmem:[#allocation8 + $0x280] ss:$8 sps:$4 sm:$0xff]  }
 0x2da   :  { %v789_v5 = vpop.f32.mrf.mxu0  ;;  %v2577_v3 = vld [vmem:[#allocation8 + $0x2b0] ss:$8 sps:$4 sm:$0xff]  }
 0x2db   :  { %v794_v7 = vmax.f32 %v788_v4, 0.0  ;;  %v790_v8 = vadd.f32 %v789_v5, %v586_v61  ;;  %v2971_v12 = vadd.f32 %v793_v6, %v287_v28  ;;  %v2537_v28 = vld [vmem:[#allocation10 + $0x194] ss:$8 sps:$4 sm:$0xff]   ;;  %v2582_v4 = vld [vmem:[#allocation8 + $0x2a4] ss:$8 sps:$4 sm:$0xff]  }
 0x2dc   :  { %v2580_v5 = vld [vmem:[#allocation8 + $0x2a0] ss:$8 sps:$4 sm:$0xff]   ;;  %v2585_v6 = vld [vmem:[#allocation8 + $0x294] ss:$8 sps:$4 sm:$0xff]  }
 0x2dd   :  { %v795_v10 = vmax.f32 %v790_v8, 0.0  ;;  %v2967_v11 = vadd.f32 %v794_v7, %v288_v27  ;;  %v2534_v27 = vld [vmem:[#allocation10 + $0x1a4] ss:$8 sps:$4 sm:$0xff]   ;;  %v2583_v7 = vld [vmem:[#allocation8 + $0x290] ss:$8 sps:$4 sm:$0xff]  }
 0x2de   :  { %1289 = vmatprep.subr.bf16.mxu0 %v2534_v27  ;;  %v2588_v8 = vld [vmem:[#allocation8 + $0x284] ss:$8 sps:$4 sm:$0xff]   ;;  %v2592_v27 = vld [vmem:[#allocation10 + $0x260] ss:$8 sps:$4 sm:$0xff]  }
 0x2df   :  { %v2975_v13 = vadd.f32 %v795_v10, %v289_v29  ;;  %v800_v23 = vpack.c.bf16 %v2967_v11, %v2979_v16  ;;  %1290 = vmatpush2.bf16.msra.mxu0 %v2532_v22  ;;  %v2540_v29 = vld [vmem:[#allocation10 + $0x184] ss:$8 sps:$4 sm:$0xff]   ;;  %v2589_v10 = vld [vmem:[#allocation10 + $0x270] ss:$8 sps:$4 sm:$0xff]   ;;  %v2597_v22 = vld [vmem:[#allocation10 + $0x254] ss:$8 sps:$4 sm:$0xff]  }
 0x2e0   :  { %1291 = vmatprep.subr.bf16.mxu0 %v2537_v28  ;;  %v2595_v28 = vld [vmem:[#allocation10 + $0x250] ss:$8 sps:$4 sm:$0xff]  }
 0x2e1   :  { %v801_v17 = vpack.c.bf16 %v2975_v13, %v2971_v12 }
 0x2e3   :  { %1040 = vmatprep.mubr.bf16.mxu1 %v801_v17  ;;  %1292 = vmatpush2.bf16.msra.mxu0 %v2535_v26  ;;  %v2591_v17 = vld [vmem:[#allocation10 + $0x274] ss:$8 sps:$4 sm:$0xff]   ;;  %v2600_v26 = vld [vmem:[#allocation10 + $0x244] ss:$8 sps:$4 sm:$0xff]  }
 0x2e4   :  { %1041 = vmatmul.mubr.bf16.vlgmr.msra.gmra.mxu1 %v800_v23  ;;  %1293 = vmatprep.subr.bf16.mxu0 %v2540_v29  ;;  %v2594_v23 = vld [vmem:[#allocation10 + $0x264] ss:$8 sps:$4 sm:$0xff]   ;;  %v2598_v29 = vld [vmem:[#allocation10 + $0x240] ss:$8 sps:$4 sm:$0xff]  }
 0x2e5   :  { %1523 = vmatpush1.bf16.msra.mxu1 %v2541_v30  ;;  %v2601_v30 = vld [vmem:[#allocation10 + $0x230] ss:$8 sps:$4 sm:$0xff]  }
 0x2e6   :  { %1524 = vmatprep.subr.bf16.mxu1 %v2546_v19  ;;  %v2604_v19 = vld [vmem:[#allocation10 + $0x220] ss:$8 sps:$4 sm:$0xff]  }
 0x2e7   :  { %1294 = vmatpush2.bf16.msra.mxu0 %v2538_v24  ;;  %v2603_v24 = vld [vmem:[#allocation10 + $0x234] ss:$8 sps:$4 sm:$0xff]  }
 0x2e8   :  { %1777 = vmatprep.subr.bf16.mxu0 %v2591_v17 }
 0x2e9   :  { %1525 = vmatpush1.bf16.msra.mxu1 %v2544_v20  ;;  %v2609_v20 = vld [vmem:[#allocation10 + $0x214] ss:$8 sps:$4 sm:$0xff]  }
 0x2ea   :  { %1526 = vmatprep.subr.bf16.mxu1 %v2549_v21  ;;  %v2607_v21 = vld [vmem:[#allocation10 + $0x210] ss:$8 sps:$4 sm:$0xff]  }
 0x2ed   :  { %1527 = vmatpush1.bf16.msra.mxu1 %v2547_v25  ;;  %v2612_v25 = vld [vmem:[#allocation10 + $0x204] ss:$8 sps:$4 sm:$0xff]  }
 0x2ee   :  { %1528 = vmatprep.subr.bf16.mxu1 %v2552_v31  ;;  %v2610_v31 = vld [vmem:[#allocation10 + $0x200] ss:$8 sps:$4 sm:$0xff]  }
 0x2f1   :  { %1529 = vmatpush1.bf16.msra.mxu1 %v2550_v32  ;;  %v2615_v32 = vld [vmem:[#allocation10 + $0x2f4] ss:$8 sps:$4 sm:$0xff]  }
 0x2f2   :  { %1530 = vmatprep.subr.bf16.mxu1 %v2555_v33  ;;  %v2613_v33 = vld [vmem:[#allocation10 + $0x2f0] ss:$8 sps:$4 sm:$0xff]  }
 0x2f5   :  { %1531 = vmatpush1.bf16.msra.mxu1 %v2553_v34  ;;  %v2618_v34 = vld [vmem:[#allocation10 + $0x2e4] ss:$8 sps:$4 sm:$0xff]  }
 0x2f6   :  { %1532 = vmatprep.subr.bf16.mxu1 %v2558_v35  ;;  %v2616_v35 = vld [vmem:[#allocation10 + $0x2e0] ss:$8 sps:$4 sm:$0xff]  }
 0x2f9   :  { %1533 = vmatpush1.bf16.msra.mxu1 %v2556_v36  ;;  %v2621_v36 = vld [vmem:[#allocation10 + $0x2d4] ss:$8 sps:$4 sm:$0xff]  }
 0x2fa   :  { %1534 = vmatprep.subr.bf16.mxu1 %v2561_v37  ;;  %v2619_v37 = vld [vmem:[#allocation10 + $0x2d0] ss:$8 sps:$4 sm:$0xff]  }
 0x2fd   :  { %1535 = vmatpush1.bf16.msra.mxu1 %v2559_v38  ;;  %v2624_v38 = vld [vmem:[#allocation10 + $0x2c4] ss:$8 sps:$4 sm:$0xff]  }
 0x2fe   :  { %1536 = vmatprep.subr.bf16.mxu1 %v2564_v39  ;;  %v2622_v39 = vld [vmem:[#allocation10 + $0x2c0] ss:$8 sps:$4 sm:$0xff]  }
 0x301   :  { %1537 = vmatpush1.bf16.msra.mxu1 %v2562_v40  ;;  %v2627_v40 = vld [vmem:[#allocation10 + $0x2b4] ss:$8 sps:$4 sm:$0xff]  }
 0x302   :  { %1538 = vmatprep.subr.bf16.mxu1 %v2567_v41  ;;  %v2625_v41 = vld [vmem:[#allocation10 + $0x2b0] ss:$8 sps:$4 sm:$0xff]  }
 0x305   :  { %1539 = vmatpush2.bf16.msra.mxu1 %v2565_v42  ;;  %v1091_v42 = vld [vmem:[#allocation11 + $0x2] sm:$0x3] }
 0x306   :  { %1540 = vmatprep.subr.bf16.mxu1 %v2570_v43  ;;  %v1100_v43 = vrot.slane %v1091_v42, %v2932_v14 }
 0x309   :  { %1541 = vmatpush2.bf16.msra.mxu1 %v2568_v44  ;;  %v1096_v44 = vrot.slane %v1091_v42, %v2934_v15 }
 0x30a   :  { %1542 = vmatprep.subr.bf16.mxu1 %v2573_v45 }
 0x30d   :  { %1543 = vmatpush2.bf16.msra.mxu1 %v2571_v46 }
 0x30e   :  { %1544 = vmatprep.subr.bf16.mxu1 %v2576_v47 }
 0x311   :  { %1545 = vmatpush2.bf16.msra.mxu1 %v2574_v48 }
 0x312   :  { %1546 = vmatprep.subr.bf16.mxu1 %v2579_v2  ;;  %v2638_v2 = vld [vmem:[#allocation13 + $0x38] sm:$0xff]  }
 0x315   :  { %1547 = vmatpush2.bf16.msra.mxu1 %v2577_v3  ;;  %v2639_v3 = vld [vmem:[#allocation13 + $0x70] sm:$0xff]  }
 0x316   :  { %1548 = vmatprep.subr.bf16.mxu1 %v2582_v4  ;;  %v2640_v4 = vld [vmem:[#allocation13 + $0x30] sm:$0xff]  }
 0x319   :  { %1549 = vmatpush2.bf16.msra.mxu1 %v2580_v5  ;;  %v2641_v5 = vld [vmem:[#allocation13 + $0x68] sm:$0xff]  }
 0x31a   :  { %1550 = vmatprep.subr.bf16.mxu1 %v2585_v6  ;;  %v2642_v6 = vld [vmem:[#allocation13 + $0x28] sm:$0xff]  }
 0x31d   :  { %1551 = vmatpush2.bf16.msra.mxu1 %v2583_v7  ;;  %v2643_v7 = vld [vmem:[#allocation13 + $0x60] sm:$0xff]  }
 0x31e   :  { %1552 = vmatprep.subr.bf16.mxu1 %v2588_v8  ;;  %v2644_v8 = vld [vmem:[#allocation13 + $0x20] sm:$0xff]  }
 0x321   :  { %1553 = vmatpush2.bf16.msra.mxu1 %v2586_v9  ;;  %v2194_v9 = vld [vmem:[%s3032_s4 + $0x4] sm:$0x3] }
 0x322   :  { %v1359_v17 = vrot.slane %v2194_v9, %v2932_v14 }
 0x3a4   :  { %v1042_v50 = vpop.f32.mrf.mxu1 }
 0x3a5   :  { %v1043_v57 = vadd.f32 %v1042_v50, %v841_v52 }
 0x3a6   :  { %v1044_v53 = vpop.f32.mrf.mxu1 }
 0x3a7   :  { %v1045_v55 = vadd.f32 %v1044_v53, %v845_v51  ;;  %v1051_v63 = vmax.f32 %v1043_v57, 0.0 }
 0x3a8   :  { %v1046_v54 = vpop.f32.mrf.mxu1 }
 0x3a9   :  { %v1047_v56 = vadd.f32 %v1046_v54, %v841_v52  ;;  %v1052_v61 = vmax.f32 %v1045_v55, 0.0 }
 0x3aa   :  { %v1048_v58 = vpop.f32.mrf.mxu1 }
 0x3ab   :  { %v1049_v59 = vadd.f32 %v1048_v58, %v845_v51  ;;  %v1053_v60 = vmax.f32 %v1047_v56, 0.0 }
 0x3ad   :  { %v1054_v62 = vmax.f32 %v1049_v59, 0.0  ;;  %v1055_v1 = vpack.c.bf16 %v1053_v60, %v1051_v63  ;;  %v2630_v63 = vld [vmem:[#allocation10 + $0x2a4] ss:$8 sps:$4 sm:$0xff]  }
 0x3af   :  { %v1056_v0 = vpack.c.bf16 %v1054_v62, %v1052_v61 }
 0x3b1   :  { %1295 = vmatprep.mubr.bf16.mxu0 %v1056_v0  ;;  %v2631_v0 = vld [vmem:[#allocation10 + $0x290] ss:$8 sps:$4 sm:$0xff]  }
 0x3b2   :  { %1296 = vmatmul.mubr.bf16.vlgmr.msra.gmra.mxu0 %v1055_v1  ;;  %v2634_v1 = vld [vmem:[#allocation10 + $0x280] ss:$8 sps:$4 sm:$0xff]  }
 0x3b3   :  { %1778 = vmatpush1.bf16.msra.mxu0 %v2589_v10 }
 0x3b4   :  { %1779 = vmatprep.subr.bf16.mxu0 %v2594_v23  ;;  %v1355_v23 = vrot.slane %v2194_v9, %v2934_v15 }
 0x3b7   :  { %1780 = vmatpush1.bf16.msra.mxu0 %v2592_v27 }
 0x3b8   :  { %1781 = vmatprep.subr.bf16.mxu0 %v2597_v22 }
 0x3bb   :  { %1782 = vmatpush1.bf16.msra.mxu0 %v2595_v28 }
 0x3bc   :  { %1783 = vmatprep.subr.bf16.mxu0 %v2600_v26 }
 0x3bf   :  { %1784 = vmatpush1.bf16.msra.mxu0 %v2598_v29 }
 0x3c0   :  { %1785 = vmatprep.subr.bf16.mxu0 %v2603_v24 }
 0x3c3   :  { %1786 = vmatpush1.bf16.msra.mxu0 %v2601_v30 }
 0x3c4   :  { %1787 = vmatprep.subr.bf16.mxu0 %v2606_v18 }
 0x3c7   :  { %1788 = vmatpush1.bf16.msra.mxu0 %v2604_v19 }
 0x3c8   :  { %1789 = vmatprep.subr.bf16.mxu0 %v2609_v20 }
 0x3cb   :  { %1790 = vmatpush1.bf16.msra.mxu0 %v2607_v21 }
 0x3cc   :  { %1791 = vmatprep.subr.bf16.mxu0 %v2612_v25 }
 0x3cf   :  { %1792 = vmatpush1.bf16.msra.mxu0 %v2610_v31 }
 0x3d0   :  { %1793 = vmatprep.subr.bf16.mxu0 %v2615_v32  ;;  %v2645_v32 = vld [vmem:[#allocation13 + $0x58] sm:$0xff]  }
 0x3d3   :  { %1794 = vmatpush2.bf16.msra.mxu0 %v2613_v33  ;;  %v2646_v33 = vld [vmem:[#allocation13 + $0x18] sm:$0xff]  }
 0x3d4   :  { %1795 = vmatprep.subr.bf16.mxu0 %v2618_v34  ;;  %v2647_v34 = vld [vmem:[#allocation13 + $0x50] sm:$0xff]  }
 0x3d7   :  { %1796 = vmatpush2.bf16.msra.mxu0 %v2616_v35  ;;  %v2648_v35 = vld [vmem:[#allocation13 + $0x10] sm:$0xff]  }
 0x3d8   :  { %1797 = vmatprep.subr.bf16.mxu0 %v2621_v36  ;;  %v2649_v36 = vld [vmem:[#allocation13 + $0x48] sm:$0xff]  }
 0x3db   :  { %1798 = vmatpush2.bf16.msra.mxu0 %v2619_v37  ;;  %v2650_v37 = vld [vmem:[#allocation13 + $0x8] sm:$0xff]  }
 0x3dc   :  { %1799 = vmatprep.subr.bf16.mxu0 %v2624_v38  ;;  %v2651_v38 = vld [vmem:[#allocation13 + $0x40] sm:$0xff]  }
 0x3df   :  { %1800 = vmatpush2.bf16.msra.mxu0 %v2622_v39  ;;  %v2652_v39 = vld [vmem:[#allocation13] sm:$0xff]  }
 0x3e0   :  { %1801 = vmatprep.subr.bf16.mxu0 %v2627_v40  ;;  %v1605_v40 = vld [vmem:[#allocation11 + $0x4] sm:$0x3] }
 0x3e1   :  { %v1610_v42 = vrot.slane %v1605_v40, %v2934_v15 }
 0x3e3   :  { %1802 = vmatpush2.bf16.msra.mxu0 %v2625_v41  ;;  %v1614_v41 = vrot.slane %v1605_v40, %v2932_v14 }
 0x3e4   :  { %1803 = vmatprep.subr.bf16.mxu0 %v2630_v63 }
 0x472   :  { %v1297_v45 = vpop.f32.mrf.mxu0 }
 0x473   :  { %v1298_v48 = vadd.f32 %v1297_v45, %v1096_v44 }
 0x474   :  { %v1299_v46 = vpop.f32.mrf.mxu0 }
 0x475   :  { %v1300_v47 = vadd.f32 %v1299_v46, %v1100_v43  ;;  %v1306_v55 = vmax.f32 %v1298_v48, 0.0 }
 0x476   :  { %v1301_v49 = vpop.f32.mrf.mxu0 }
 0x477   :  { %v1302_v50 = vadd.f32 %v1301_v49, %v1096_v44  ;;  %v1307_v52 = vmax.f32 %v1300_v47, 0.0  ;;  %v3002_v60 = vadd.f32 %v1306_v55, %v2979_v16  ;;  %v2637_v16 = vld [vmem:[#allocation13 + $0x78] sm:$0xff]  }
 0x478   :  { %v1303_v51 = vpop.f32.mrf.mxu0  ;;  %2287 = vmatprep.subr.bf16.mxu1 %v2637_v16 }
 0x479   :  { %v1308_v53 = vmax.f32 %v1302_v50, 0.0  ;;  %v1304_v54 = vadd.f32 %v1303_v51, %v1100_v43  ;;  %v2996_v58 = vadd.f32 %v1307_v52, %v2971_v12  ;;  %v2633_v12 = vld [vmem:[#allocation10 + $0x294] ss:$8 sps:$4 sm:$0xff]  }
 0x47b   :  { %v1309_v56 = vmax.f32 %v1304_v54, 0.0  ;;  %v2993_v57 = vadd.f32 %v1308_v53, %v2967_v11  ;;  %v2628_v11 = vld [vmem:[#allocation10 + $0x2a0] ss:$8 sps:$4 sm:$0xff]  }
 0x47c   :  { %1804 = vmatpush2.bf16.msra.mxu0 %v2628_v11  ;;  %v2259_v11 = vld [vmem:[%s3036_s8] ss:$0 sm:$0xff]  ;;  %s2801_s8 = scalar_lea.vmem %s2034_s29, 128 }
 0x47d   :  { %v2999_v59 = vadd.f32 %v1309_v56, %v2975_v13  ;;  %v1314_v62 = vpack.c.bf16 %v2993_v57, %v3002_v60  ;;  %1805 = vmatprep.subr.bf16.mxu0 %v2633_v12  ;;  %v2636_v13 = vld [vmem:[#allocation10 + $0x284] ss:$8 sps:$4 sm:$0xff]   ;;  %p2802_p7 = scmp.ne.s32.totalorder %s2034_s29, %s2801_s8  ;;  %p2807_p9 = scmp.lt.s32.totalorder %s2801_s8, %s2801_s8 }
 0x47f   :  { %v1315_v61 = vpack.c.bf16 %v2999_v59, %v2996_v58  ;;  %p2808_p10 = por %p2807_p9, %p2806_p8 }
 0x480   :  { %1806 = vmatpush2.bf16.msra.mxu0 %v2631_v0 }
 0x481   :  { %1554 = vmatprep.mubr.bf16.mxu1 %v1315_v61  ;;  %1807 = vmatprep.subr.bf16.mxu0 %v2636_v13  ;;  %p2809_p11 = pnand %p2808_p10, %p2802_p7 }
 0x482   :  { %1555 = vmatmul.mubr.bf16.vlgmr.msra.gmra.mxu1 %v1314_v62 }
 0x483   :  { %2288 = vmatpush3.bf16.msra.mxu1 %v2638_v2 }
 0x484   :  { %1808 = vmatpush2.bf16.msra.mxu0 %v2634_v1  ;;  %2289 = vmatprep.subr.bf16.mxu1 %v2639_v3 }
 0x487   :  { %2290 = vmatpush3.bf16.msra.mxu1 %v2640_v4 }
 0x488   :  { %2291 = vmatprep.subr.bf16.mxu1 %v2641_v5 }
 0x48b   :  { %2292 = vmatpush3.bf16.msra.mxu1 %v2642_v6 }
 0x48c   :  { %2293 = vmatprep.subr.bf16.mxu1 %v2643_v7 }
 0x48f   :  { %2294 = vmatpush3.bf16.msra.mxu1 %v2644_v8 }
 0x490   :  { %2295 = vmatprep.subr.bf16.mxu1 %v2645_v32 }
 0x493   :  { %2296 = vmatpush3.bf16.msra.mxu1 %v2646_v33 }
 0x494   :  { %2297 = vmatprep.subr.bf16.mxu1 %v2647_v34 }
 0x497   :  { %2298 = vmatpush3.bf16.msra.mxu1 %v2648_v35 }
 0x498   :  { %2299 = vmatprep.subr.bf16.mxu1 %v2649_v36 }
 0x49b   :  { %2300 = vmatpush3.bf16.msra.mxu1 %v2650_v37 }
 0x49c   :  { %2301 = vmatprep.subr.bf16.mxu1 %v2651_v38 }
 0x49f   :  { %2302 = vmatpush3.bf16.msra.mxu1 %v2652_v39 }
 0x542   :  { %v1556_v10 = vpop.f32.mrf.mxu1 }
 0x543   :  { %v1557_v29 = vadd.f32 %v1556_v10, %v1355_v23 }
 0x544   :  { %v1558_v27 = vpop.f32.mrf.mxu1 }
 0x545   :  { %v1559_v28 = vadd.f32 %v1558_v27, %v1359_v17  ;;  %v1565_v21 = vmax.f32 %v1557_v29, 0.0 }
 0x546   :  { %v1560_v22 = vpop.f32.mrf.mxu1 }
 0x547   :  { %v1561_v26 = vadd.f32 %v1560_v22, %v1355_v23  ;;  %v1566_v19 = vmax.f32 %v1559_v28, 0.0 }
 0x548   :  { %v1562_v24 = vpop.f32.mrf.mxu1 }
 0x549   :  { %v1563_v30 = vadd.f32 %v1562_v24, %v1359_v17  ;;  %v1567_v18 = vmax.f32 %v1561_v26, 0.0 }
 0x54b   :  { %v1568_v20 = vmax.f32 %v1563_v30, 0.0  ;;  %v1569_v31 = vpack.c.bf16 %v1567_v18, %v1565_v21 }
 0x54d   :  { %v1570_v25 = vpack.c.bf16 %v1568_v20, %v1566_v19 }
 0x54f   :  { %1809 = vmatprep.mubr.bf16.mxu0 %v1570_v25 }
 0x550   :  { %1810 = vmatmul.mubr.bf16.vlgmr.msra.gmra.mxu0 %v1569_v31 }
 0x610   :  { %v1811_v43 = vpop.f32.mrf.mxu0 }
 0x611   :  { %v1812_v46 = vadd.f32 %v1811_v43, %v1610_v42 }
 0x612   :  { %v1813_v44 = vpop.f32.mrf.mxu0 }
 0x613   :  { %v1814_v45 = vadd.f32 %v1813_v44, %v1614_v41  ;;  %v1820_v53 = vmax.f32 %v1812_v46, 0.0 }
 0x614   :  { %v1815_v47 = vpop.f32.mrf.mxu0 }
 0x615   :  { %v1816_v48 = vadd.f32 %v1815_v47, %v1610_v42  ;;  %v1821_v50 = vmax.f32 %v1814_v45, 0.0  ;;  %v1824_v15 = vadd.f32 %v1820_v53, %v3002_v60 }
 0x616   :  { %v1817_v49 = vpop.f32.mrf.mxu0 }
 0x617   :  { %v1822_v51 = vmax.f32 %v1816_v48, 0.0  ;;  %v1818_v52 = vadd.f32 %v1817_v49, %v1614_v41  ;;  %v1825_v56 = vadd.f32 %v1821_v50, %v2996_v58 }
 0x619   :  { %v1823_v54 = vmax.f32 %v1818_v52, 0.0  ;;  %v1826_v55 = vadd.f32 %v1822_v51, %v2993_v57 }
 0x61b   :  { %v1827_v14 = vadd.f32 %v1823_v54, %v2999_v59  ;;  %v1828_v62 = vpack.c.bf16 %v1826_v55, %v1824_v15 }
 0x61d   :  { %v1829_v61 = vpack.c.bf16 %v1827_v14, %v1825_v56 }
 0x61f   :  { %1997 = vmatprep.mubr.bf16.mxu1 %v1829_v61 }
 0x620   :  { %1998 = vmatmul.mubr.bf16.vlgmr.msra.gmra.mxu1 %v1828_v62 }
 0x6e0   :  { %v2303_v63 = vpop.f32.mrf.mxu1 }
 0x6e2   :  { %v2304_v12 = vpop.f32.mrf.mxu1 }
 0x6e3   :  { %v2305_v0 = vadd.f32 %v2304_v12, %v2303_v63 }
 0x6e4   :  { %v2306_v13 = vpop.f32.mrf.mxu1 }
 0x6e5   :  { %v2000_v1 = vadd.f32 %v2305_v0, %v2259_v11 }
 0x6e6   :  { %v2307_v57 = vpop.f32.mrf.mxu1 }
 0x6e7   :  { %v2276_v16 = vmul.f32 -1.442695, %v2000_v1  ;;  %v2308_v58 = vadd.f32 %v2307_v57, %v2306_v13 }
 0x6e9   :  { %2653 = vpow2.f32 %v2276_v16  ;;  %v2003_v59 = vadd.f32 %v2308_v58, %v2259_v11 }
 0x6eb   :  { %v2277_v2 = vmul.f32 -1.442695, %v2003_v59 }
 0x6ed   :  { %2655 = vpow2.f32 %v2277_v2 }
 0x6f6   :  { %v2654_v60 = vpop.eup %2653 }
 0x6f7   :  { %v2012_v3 = vadd.f32 1.0, %v2654_v60 }
 0x6f9   :  { %2657 = vrcp.f32 %v2012_v3 }
 0x6fa   :  { %v2656_v4 = vpop.eup %2655 }
 0x6fb   :  { %v2013_v5 = vadd.f32 1.0, %v2656_v4 }
 0x6fd   :  { %2659 = vrcp.f32 %v2013_v5 }
 0x706   :  { %v2658_v6 = vpop.eup %2657 }
 0x70a   :  { %v2660_v7 = vpop.eup %2659 }
 0x70b   :  { %v2285_v8 = vpack.c.bf16 %v2660_v7, %v2658_v6 }
 0x70d   :  { %2286 = vst [vmem:[#allocation14] sm:$0xff] %v2285_v8  }
 0x70e   :  { %2812 = shalt.err (!%p2809_p11)
}
 0x70f   :  { %2039 = dma.vmem_to_hbm [thread:$0]  %s2034_s29, 128, %s3037_s9, [#allocation4], %s2839_s3, %s2839_s3, %s2840_s30  }
 0x710   :  { %2829 = dma.done.wait [#allocation4], 128  }
 0x711   :  { %2830 = vsyncadd [#allocation4], 4294967168 }
 0x712   :  { %2043 = vsyncpa [#allocation3], 1 }
 0x713   :  { %2044 = vsyncpa [#allocation6], 1 }
 0x714   :  { %2045 = vsyncpa [#allocation9], 1 }
 0x715   :  { %2046 = vsyncpa [#allocation12], 1 }
 0x716   :  { %2047 = vsyncpa [#allocation4], 1 }

</bundles_post_ra>
